<compile_context>
chip_gen: v7x
topology: tpu7x:2x2x1
jax: 0.10.0
libtpu: 0.0.40
codegen_flags: <defaults>
</compile_context>

<pallas_src>
import jax
import jax.numpy as jnp
from jax.experimental import pallas as pl
from jax.experimental.pallas import tpu as pltpu


# ------------------------------- Pallas kernel ------------------------------ #

def fused_si_logprob_kernel(x3_ref, wband_ref, cbias_ref, wfc_ref, fcb_ref,
                            obs_ref, invs_ref, lpc_ref, o_ref, feat_ref):
    """Fused conv(3x3,pad=1)+bias+ELU -> Linear -> Normal.log_prob (one block).

    x3_ref   : (BLK_B*H, 256)   im2col'd input rows, ordered (h, b); cols are
                                 (dy, wx, c) zero-padded 216 -> 256
    wband_ref: (256, W*K)        banded conv weight (dy rows concatenated, padded)
    cbias_ref: (1, W*K)          conv bias tiled over w
    wfc_ref  : (H*W*K, Npad)     FC weight, feature order (h, w, k), N padded
    fcb_ref  : (1, Npad)         FC bias (padded)
    obs_ref  : (BLK_B, Npad)     observations (padded)
    invs_ref : (1, Npad)         exp(-log_scale) (padded with 1)
    lpc_ref  : (1, Npad)         -log_scale - 0.5*log(2*pi) (padded)
    o_ref    : (BLK_B, Npad)     output log_prob (padded lanes sliced off outside)
    feat_ref : (BLK_B, H*W*K)    VMEM scratch, dense per-image feature rows
    """
    blk_b, hwk = feat_ref.shape
    wk = wband_ref.shape[1]
    H = hwk // wk

    # --- conv: a single MXU matmul for the whole batch block ---
    z = jnp.dot(x3_ref[...], wband_ref[...],
                preferred_element_type=jnp.float32) + cbias_ref[...]
    # ELU(alpha=1): z if z > 0 else exp(z) - 1  (single EUP op per element).
    y = jnp.where(z > 0.0, z, jnp.exp(jnp.minimum(z, 0.0)) - 1.0)

    # --- regather rows (h, b) -> feat[b, h*WK:(h+1)*WK]; aligned (8,128) slabs ---
    for h in range(H):
        feat_ref[:, h * wk:(h + 1) * wk] = y[h * blk_b:(h + 1) * blk_b, :]

    # --- FC readout: one (BLK_B, H*W*K) @ (H*W*K, Npad) matmul ---
    loc = jnp.dot(feat_ref[...], wfc_ref[...],
                  preferred_element_type=jnp.float32) + fcb_ref[...]

    # --- Normal(loc, exp(log_scale)).log_prob(obs), lane-dense ---
    zz = (obs_ref[...] - loc) * invs_ref[...]
    o_ref[...] = -0.5 * (zz * zz) + lpc_ref[...]


# --------------------- hoisted parameter-only preprocessing ------------------ #

def precompute_kernel_params(params, H, W, n_pad=128, k_pad=256):
    """Done ONCE at init (pure parameter transforms, no activations)."""
    conv_w, conv_b, fc_w, fc_b, log_scale = params
    K, C, KH, KW = conv_w.shape
    N = fc_w.shape[0]
    Wp = W + 2

    # Banded conv weight: row index dy*(Wp*C) + wx*C + c, col index w*K + k,
    # value conv_w[k, c, dy, wx - w] for 0 <= wx - w < KW, else 0.
    wx = jnp.arange(Wp)[:, None]
    w = jnp.arange(W)[None, :]
    dx = wx - w                                           # (Wp, W)
    valid = (dx >= 0) & (dx < KW)
    dx_c = jnp.clip(dx, 0, KW - 1)
    cw = conv_w.transpose(2, 3, 1, 0)                     # (KH, KW, C, K)
    vals = cw[:, dx_c]                                    # (KH, Wp, W, C, K)
    vals = jnp.where(valid[None, :, :, None, None], vals, 0.0)
    wband = vals.transpose(0, 1, 3, 2, 4).reshape(KH * Wp * C, W * K)  # (216,128)
    wband = jnp.pad(wband, ((0, k_pad - KH * Wp * C), (0, 0)))         # (256,128)

    cbias_row = jnp.tile(conv_b, (W,)).reshape(1, W * K)  # [w*K + k] -> conv_b[k]

    # torch flatten order of the conv output is (k, h, w); kernel feature order
    # is (h, w, k):  wfc[h*W*K + w*K + k, n] = fc_w[n, k*H*W + h*W + w].
    wfc = fc_w.reshape(N, K, H, W).transpose(2, 3, 1, 0).reshape(H * W * K, N)
    wfc = jnp.pad(wfc, ((0, 0), (0, n_pad - N)))                       # (2048,128)

    fcb_row = jnp.pad(fc_b, (0, n_pad - N)).reshape(1, n_pad)
    invs_row = jnp.pad(jnp.exp(-log_scale), (0, n_pad - N),
                       constant_values=1.0).reshape(1, n_pad)
    lpc_row = jnp.pad(-log_scale - 0.5 * jnp.log(2.0 * jnp.pi),
                      (0, n_pad - N)).reshape(1, n_pad)
    return wband, cbias_row, wfc, fcb_row, invs_row, lpc_row


# --------------------------------- forward ----------------------------------- #

def probabilistic_si_forward(obs, cond, kparams, blk_b=8):
    """Pallas forward: Normal(si_model(cond), exp(log_scale)).log_prob(obs)."""
    wband, cbias_row, wfc, fcb_row, invs_row, lpc_row = kparams
    B, C, H, W = cond.shape
    N = obs.shape[1]
    Wp = W + 2
    WK = wband.shape[1]          # W * K
    Kpad = wband.shape[0]        # padded im2col contraction dim (256)
    Npad = wfc.shape[1]          # padded neuron dim (128)
    F = 3 * Wp * C               # un-padded im2col row width (216)

    blk_b = min(blk_b, B)
    assert B % blk_b == 0, (B, blk_b)
    nb = B // blk_b
    rows_per_blk = H * blk_b

    # Per-call XLA glue: zero-pad + NHWC + stack the 3 kernel-row shifted views
    # (im2col over rows only) -> (B*H, 256), rows grouped (block, h, b_within).
    xp = jnp.pad(cond, ((0, 0), (0, 0), (1, 1), (1, 1)))       # (B, C, H+2, W+2)
    xn = xp.transpose(0, 2, 3, 1)                              # (B, H+2, W+2, C)
    views = [xn[:, dy:dy + H].reshape(B, H, Wp * C) for dy in range(3)]
    x3 = jnp.concatenate(views, axis=-1)                       # (B, H, 216)
    x3 = x3.reshape(nb, blk_b, H, F).transpose(0, 2, 1, 3)     # (nb, H, blk_b, F)
    x3 = x3.reshape(nb * rows_per_blk, F)
    x3 = jnp.pad(x3, ((0, 0), (0, Kpad - F)))                  # (B*H, 256)

    obs_p = jnp.pad(obs, ((0, 0), (0, Npad - N)))              # (B, Npad)

    operands = (x3, wband, cbias_row, wfc, fcb_row, obs_p, invs_row, lpc_row)

    flops = 2 * B * H * Kpad * WK + 2 * B * (H * WK) * Npad
    bytes_accessed = sum(int(a.size) * a.dtype.itemsize for a in operands)
    bytes_accessed += B * Npad * 4

    in_specs = [
        pl.BlockSpec((rows_per_blk, Kpad), lambda i: (i, 0)),   # x3 (advances)
        pl.BlockSpec((Kpad, WK), lambda i: (0, 0)),             # wband (resident)
        pl.BlockSpec((1, WK), lambda i: (0, 0)),                # conv bias
        pl.BlockSpec((H * WK, Npad), lambda i: (0, 0)),         # wfc (resident)
        pl.BlockSpec((1, Npad), lambda i: (0, 0)),              # fc bias
        pl.BlockSpec((blk_b, Npad), lambda i: (i, 0)),          # obs (advances)
        pl.BlockSpec((1, Npad), lambda i: (0, 0)),              # exp(-log_scale)
        pl.BlockSpec((1, Npad), lambda i: (0, 0)),              # log_prob const
    ]
    out_specs = pl.BlockSpec((blk_b, Npad), lambda i: (i, 0))

    out_p = pl.pallas_call(
        fused_si_logprob_kernel,
        out_shape=jax.ShapeDtypeStruct((B, Npad), jnp.float32),
        grid=(nb,),
        in_specs=in_specs,
        out_specs=out_specs,
        scratch_shapes=[pltpu.VMEM((blk_b, H * WK), jnp.float32)],
        compiler_params=pltpu.CompilerParams(
            dimension_semantics=("parallel",)),
        cost_estimate=pl.CostEstimate(
            flops=flops,
            transcendentals=B * H * WK,
            bytes_accessed=bytes_accessed),
    )(*operands)

    return out_p[:, :N]


# ------------------------------ pure-JAX reference --------------------------- #

def reference_forward(obs, cond, params):
    conv_w, conv_b, fc_w, fc_b, log_scale = params
    B = cond.shape[0]
    y = jax.lax.conv_general_dilated(
        cond, conv_w, window_strides=(1, 1), padding="SAME",
        dimension_numbers=("NCHW", "OIHW", "NCHW"),
        precision=jax.lax.Precision.HIGHEST)
    y = y + conv_b[None, :, None, None]
    y = jnp.where(y > 0.0, y, jnp.expm1(jnp.minimum(y, 0.0)))     # ELU
    feat = y.reshape(B, -1)                                        # torch (k,h,w)
    loc = jnp.dot(feat, fc_w.T, precision=jax.lax.Precision.HIGHEST) + fc_b
    z = (obs - loc) * jnp.exp(-log_scale)
    return -0.5 * z * z - log_scale - 0.5 * jnp.log(2.0 * jnp.pi)


# ----------------------------------- main ------------------------------------ #

if __name__ == "__main__":
    B, C, H, W = 16, 4, 16, 16    # cond (images), NCHW
    K = 8                         # conv output channels
    N = 32                        # neurons / obs dim

    key = jax.random.PRNGKey(0)
    k_cond, k_obs, k_cw, k_cb, k_fw, k_fb, k_ls = jax.random.split(key, 7)

    cond = jax.random.normal(k_cond, (B, C, H, W), jnp.float32)
    obs = jax.random.normal(k_obs, (B, N), jnp.float32)

    # PyTorch-layout parameters
    conv_w = 0.1 * jax.random.normal(k_cw, (K, C, 3, 3), jnp.float32)    # OIHW
    conv_b = 0.1 * jax.random.normal(k_cb, (K,), jnp.float32)
    fc_w = 0.02 * jax.random.normal(k_fw, (N, K * H * W), jnp.float32)   # (out, in)
    fc_b = 0.1 * jax.random.normal(k_fb, (N,), jnp.float32)
    log_scale = 0.1 * jax.random.normal(k_ls, (N,), jnp.float32)

    params = (conv_w, conv_b, fc_w, fc_b, log_scale)

    # Hoisted parameter-only preprocessing (once at init, off the forward path).
    kparams = jax.tree_util.tree_map(jax.block_until_ready,
                                     precompute_kernel_params(params, H, W))

    fwd = jax.jit(probabilistic_si_forward)
    out = jax.block_until_ready(fwd(obs, cond, kparams))

    ref = jax.block_until_ready(reference_forward(obs, cond, params))
    assert out.shape == (B, N), out.shape
    max_err = float(jnp.max(jnp.abs(out - ref)))
    assert jnp.allclose(out, ref, rtol=1e-4, atol=1e-4), max_err

    print("KERNEL_OK")
</pallas_src>

<mosaic_0001>
module attributes {stable_mosaic.version = 11 : i64} {
  func.func @fused_si_logprob_kernel(%arg0: i32, %arg1: memref<128x256xf32, #tpu.memory_space<vmem>>, %arg2: memref<256x128xf32, #tpu.memory_space<vmem>>, %arg3: memref<1x128xf32, #tpu.memory_space<vmem>>, %arg4: memref<2048x128xf32, #tpu.memory_space<vmem>>, %arg5: memref<1x128xf32, #tpu.memory_space<vmem>>, %arg6: memref<8x128xf32, #tpu.memory_space<vmem>>, %arg7: memref<1x128xf32, #tpu.memory_space<vmem>>, %arg8: memref<1x128xf32, #tpu.memory_space<vmem>>, %arg9: memref<8x128xf32, #tpu.memory_space<vmem>>, %arg10: memref<8x2048xf32, #tpu.memory_space<vmem>>) attributes {dimension_semantics = [#tpu.dimension_semantics<parallel>], iteration_bounds = array<i64: 2>, scalar_prefetch = 0 : i64, scratch_operands = 1 : i64, tpu.core_type = #tpu.core_type<tc>, window_params = [{transform_indices = @transform_0, window_bounds = array<i64: 128, 256>}, {pipeline_mode = #tpu.pipeline_mode<synchronous>, transform_indices = @transform_1, window_bounds = array<i64: 256, 128>}, {pipeline_mode = #tpu.pipeline_mode<synchronous>, transform_indices = @transform_2, window_bounds = array<i64: 1, 128>}, {pipeline_mode = #tpu.pipeline_mode<synchronous>, transform_indices = @transform_3, window_bounds = array<i64: 2048, 128>}, {pipeline_mode = #tpu.pipeline_mode<synchronous>, transform_indices = @transform_4, window_bounds = array<i64: 1, 128>}, {transform_indices = @transform_5, window_bounds = array<i64: 8, 128>}, {pipeline_mode = #tpu.pipeline_mode<synchronous>, transform_indices = @transform_6, window_bounds = array<i64: 1, 128>}, {pipeline_mode = #tpu.pipeline_mode<synchronous>, transform_indices = @transform_7, window_bounds = array<i64: 1, 128>}, {transform_indices = @transform_8, window_bounds = array<i64: 8, 128>}]} {
    %c0 = arith.constant 0 : index
    %c0_0 = arith.constant 0 : index
    %0 = vector.load %arg1[%c0, %c0_0] : memref<128x256xf32, #tpu.memory_space<vmem>>, vector<128x256xf32>
    %c0_1 = arith.constant 0 : index
    %c0_2 = arith.constant 0 : index
    %1 = vector.load %arg2[%c0_1, %c0_2] : memref<256x128xf32, #tpu.memory_space<vmem>>, vector<256x128xf32>
    %cst = arith.constant dense<0.000000e+00> : vector<128x128xf32>
    %2 = tpu.matmul %0, %1, %cst {dimension_numbers = #tpu.dot_dimension_numbers<[1], [0], [0], [1], [0, 0, 1, 1], [], []>} : vector<128x256xf32>, vector<256x128xf32>, vector<128x128xf32> -> vector<128x128xf32>
    %c0_3 = arith.constant 0 : index
    %c0_4 = arith.constant 0 : index
    %3 = vector.load %arg3[%c0_3, %c0_4] : memref<1x128xf32, #tpu.memory_space<vmem>>, vector<1x128xf32>
    %4 = vector.broadcast %3 : vector<1x128xf32> to vector<128x128xf32>
    %5 = arith.addf %2, %4 : vector<128x128xf32>
    %cst_5 = arith.constant 0.000000e+00 : f32
    %6 = vector.broadcast %cst_5 : f32 to vector<128x128xf32>
    %7 = arith.cmpf ogt, %5, %6 : vector<128x128xf32>
    %cst_6 = arith.constant 0.000000e+00 : f32
    %8 = vector.broadcast %cst_6 : f32 to vector<128x128xf32>
    %9 = arith.minimumf %5, %8 : vector<128x128xf32>
    %10 = math.exp %9 : vector<128x128xf32>
    %cst_7 = arith.constant 1.000000e+00 : f32
    %11 = vector.broadcast %cst_7 : f32 to vector<128x128xf32>
    %12 = arith.subf %10, %11 : vector<128x128xf32>
    %13 = arith.select %7, %5, %12 : vector<128x128xi1>, vector<128x128xf32>
    %14 = vector.extract_strided_slice %13 {offsets = [0, 0], sizes = [8, 128], strides = [1, 1]} : vector<128x128xf32> to vector<8x128xf32>
    %c0_8 = arith.constant 0 : index
    %c0_9 = arith.constant 0 : index
    %15 = vector.load %arg10[%c0_8, %c0_9] : memref<8x2048xf32, #tpu.memory_space<vmem>>, vector<8x128xf32>
    tpu.vector_store %arg10[%c0_8, %c0_9], %14 {strides = array<i32>} : memref<8x2048xf32, #tpu.memory_space<vmem>>, vector<8x128xf32>,
    %16 = vector.extract_strided_slice %13 {offsets = [8, 0], sizes = [8, 128], strides = [1, 1]} : vector<128x128xf32> to vector<8x128xf32>
    %c0_10 = arith.constant 0 : index
    %c128 = arith.constant 128 : index
    %17 = vector.load %arg10[%c0_10, %c128] : memref<8x2048xf32, #tpu.memory_space<vmem>>, vector<8x128xf32>
    tpu.vector_store %arg10[%c0_10, %c128], %16 {strides = array<i32>} : memref<8x2048xf32, #tpu.memory_space<vmem>>, vector<8x128xf32>,
    %18 = vector.extract_strided_slice %13 {offsets = [16, 0], sizes = [8, 128], strides = [1, 1]} : vector<128x128xf32> to vector<8x128xf32>
    %c0_11 = arith.constant 0 : index
    %c256 = arith.constant 256 : index
    %19 = vector.load %arg10[%c0_11, %c256] : memref<8x2048xf32, #tpu.memory_space<vmem>>, vector<8x128xf32>
    tpu.vector_store %arg10[%c0_11, %c256], %18 {strides = array<i32>} : memref<8x2048xf32, #tpu.memory_space<vmem>>, vector<8x128xf32>,
    %20 = vector.extract_strided_slice %13 {offsets = [24, 0], sizes = [8, 128], strides = [1, 1]} : vector<128x128xf32> to vector<8x128xf32>
    %c0_12 = arith.constant 0 : index
    %c384 = arith.constant 384 : index
    %21 = vector.load %arg10[%c0_12, %c384] : memref<8x2048xf32, #tpu.memory_space<vmem>>, vector<8x128xf32>
    tpu.vector_store %arg10[%c0_12, %c384], %20 {strides = array<i32>} : memref<8x2048xf32, #tpu.memory_space<vmem>>, vector<8x128xf32>,
    %22 = vector.extract_strided_slice %13 {offsets = [32, 0], sizes = [8, 128], strides = [1, 1]} : vector<128x128xf32> to vector<8x128xf32>
    %c0_13 = arith.constant 0 : index
    %c512 = arith.constant 512 : index
    %23 = vector.load %arg10[%c0_13, %c512] : memref<8x2048xf32, #tpu.memory_space<vmem>>, vector<8x128xf32>
    tpu.vector_store %arg10[%c0_13, %c512], %22 {strides = array<i32>} : memref<8x2048xf32, #tpu.memory_space<vmem>>, vector<8x128xf32>,
    %24 = vector.extract_strided_slice %13 {offsets = [40, 0], sizes = [8, 128], strides = [1, 1]} : vector<128x128xf32> to vector<8x128xf32>
    %c0_14 = arith.constant 0 : index
    %c640 = arith.constant 640 : index
    %25 = vector.load %arg10[%c0_14, %c640] : memref<8x2048xf32, #tpu.memory_space<vmem>>, vector<8x128xf32>
    tpu.vector_store %arg10[%c0_14, %c640], %24 {strides = array<i32>} : memref<8x2048xf32, #tpu.memory_space<vmem>>, vector<8x128xf32>,
    %26 = vector.extract_strided_slice %13 {offsets = [48, 0], sizes = [8, 128], strides = [1, 1]} : vector<128x128xf32> to vector<8x128xf32>
    %c0_15 = arith.constant 0 : index
    %c768 = arith.constant 768 : index
    %27 = vector.load %arg10[%c0_15, %c768] : memref<8x2048xf32, #tpu.memory_space<vmem>>, vector<8x128xf32>
    tpu.vector_store %arg10[%c0_15, %c768], %26 {strides = array<i32>} : memref<8x2048xf32, #tpu.memory_space<vmem>>, vector<8x128xf32>,
    %28 = vector.extract_strided_slice %13 {offsets = [56, 0], sizes = [8, 128], strides = [1, 1]} : vector<128x128xf32> to vector<8x128xf32>
    %c0_16 = arith.constant 0 : index
    %c896 = arith.constant 896 : index
    %29 = vector.load %arg10[%c0_16, %c896] : memref<8x2048xf32, #tpu.memory_space<vmem>>, vector<8x128xf32>
    tpu.vector_store %arg10[%c0_16, %c896], %28 {strides = array<i32>} : memref<8x2048xf32, #tpu.memory_space<vmem>>, vector<8x128xf32>,
    %30 = vector.extract_strided_slice %13 {offsets = [64, 0], sizes = [8, 128], strides = [1, 1]} : vector<128x128xf32> to vector<8x128xf32>
    %c0_17 = arith.constant 0 : index
    %c1024 = arith.constant 1024 : index
    %31 = vector.load %arg10[%c0_17, %c1024] : memref<8x2048xf32, #tpu.memory_space<vmem>>, vector<8x128xf32>
    tpu.vector_store %arg10[%c0_17, %c1024], %30 {strides = array<i32>} : memref<8x2048xf32, #tpu.memory_space<vmem>>, vector<8x128xf32>,
    %32 = vector.extract_strided_slice %13 {offsets = [72, 0], sizes = [8, 128], strides = [1, 1]} : vector<128x128xf32> to vector<8x128xf32>
    %c0_18 = arith.constant 0 : index
    %c1152 = arith.constant 1152 : index
    %33 = vector.load %arg10[%c0_18, %c1152] : memref<8x2048xf32, #tpu.memory_space<vmem>>, vector<8x128xf32>
    tpu.vector_store %arg10[%c0_18, %c1152], %32 {strides = array<i32>} : memref<8x2048xf32, #tpu.memory_space<vmem>>, vector<8x128xf32>,
    %34 = vector.extract_strided_slice %13 {offsets = [80, 0], sizes = [8, 128], strides = [1, 1]} : vector<128x128xf32> to vector<8x128xf32>
    %c0_19 = arith.constant 0 : index
    %c1280 = arith.constant 1280 : index
    %35 = vector.load %arg10[%c0_19, %c1280] : memref<8x2048xf32, #tpu.memory_space<vmem>>, vector<8x128xf32>
    tpu.vector_store %arg10[%c0_19, %c1280], %34 {strides = array<i32>} : memref<8x2048xf32, #tpu.memory_space<vmem>>, vector<8x128xf32>,
    %36 = vector.extract_strided_slice %13 {offsets = [88, 0], sizes = [8, 128], strides = [1, 1]} : vector<128x128xf32> to vector<8x128xf32>
    %c0_20 = arith.constant 0 : index
    %c1408 = arith.constant 1408 : index
    %37 = vector.load %arg10[%c0_20, %c1408] : memref<8x2048xf32, #tpu.memory_space<vmem>>, vector<8x128xf32>
    tpu.vector_store %arg10[%c0_20, %c1408], %36 {strides = array<i32>} : memref<8x2048xf32, #tpu.memory_space<vmem>>, vector<8x128xf32>,
    %38 = vector.extract_strided_slice %13 {offsets = [96, 0], sizes = [8, 128], strides = [1, 1]} : vector<128x128xf32> to vector<8x128xf32>
    %c0_21 = arith.constant 0 : index
    %c1536 = arith.constant 1536 : index
    %39 = vector.load %arg10[%c0_21, %c1536] : memref<8x2048xf32, #tpu.memory_space<vmem>>, vector<8x128xf32>
    tpu.vector_store %arg10[%c0_21, %c1536], %38 {strides = array<i32>} : memref<8x2048xf32, #tpu.memory_space<vmem>>, vector<8x128xf32>,
    %40 = vector.extract_strided_slice %13 {offsets = [104, 0], sizes = [8, 128], strides = [1, 1]} : vector<128x128xf32> to vector<8x128xf32>
    %c0_22 = arith.constant 0 : index
    %c1664 = arith.constant 1664 : index
    %41 = vector.load %arg10[%c0_22, %c1664] : memref<8x2048xf32, #tpu.memory_space<vmem>>, vector<8x128xf32>
    tpu.vector_store %arg10[%c0_22, %c1664], %40 {strides = array<i32>} : memref<8x2048xf32, #tpu.memory_space<vmem>>, vector<8x128xf32>,
    %42 = vector.extract_strided_slice %13 {offsets = [112, 0], sizes = [8, 128], strides = [1, 1]} : vector<128x128xf32> to vector<8x128xf32>
    %c0_23 = arith.constant 0 : index
    %c1792 = arith.constant 1792 : index
    %43 = vector.load %arg10[%c0_23, %c1792] : memref<8x2048xf32, #tpu.memory_space<vmem>>, vector<8x128xf32>
    tpu.vector_store %arg10[%c0_23, %c1792], %42 {strides = array<i32>} : memref<8x2048xf32, #tpu.memory_space<vmem>>, vector<8x128xf32>,
    %44 = vector.extract_strided_slice %13 {offsets = [120, 0], sizes = [8, 128], strides = [1, 1]} : vector<128x128xf32> to vector<8x128xf32>
    %c0_24 = arith.constant 0 : index
    %c1920 = arith.constant 1920 : index
    %45 = vector.load %arg10[%c0_24, %c1920] : memref<8x2048xf32, #tpu.memory_space<vmem>>, vector<8x128xf32>
    tpu.vector_store %arg10[%c0_24, %c1920], %44 {strides = array<i32>} : memref<8x2048xf32, #tpu.memory_space<vmem>>, vector<8x128xf32>,
    %c0_25 = arith.constant 0 : index
    %c0_26 = arith.constant 0 : index
    %46 = vector.load %arg10[%c0_25, %c0_26] : memref<8x2048xf32, #tpu.memory_space<vmem>>, vector<8x2048xf32>
    %c0_27 = arith.constant 0 : index
    %c0_28 = arith.constant 0 : index
    %47 = vector.load %arg4[%c0_27, %c0_28] : memref<2048x128xf32, #tpu.memory_space<vmem>>, vector<2048x128xf32>
    %cst_29 = arith.constant dense<0.000000e+00> : vector<8x128xf32>
    %48 = tpu.matmul %46, %47, %cst_29 {dimension_numbers = #tpu.dot_dimension_numbers<[1], [0], [0], [1], [0, 0, 1, 1], [], []>} : vector<8x2048xf32>, vector<2048x128xf32>, vector<8x128xf32> -> vector<8x128xf32>
    %c0_30 = arith.constant 0 : index
    %c0_31 = arith.constant 0 : index
    %49 = vector.load %arg5[%c0_30, %c0_31] : memref<1x128xf32, #tpu.memory_space<vmem>>, vector<1x128xf32>
    %50 = vector.broadcast %49 : vector<1x128xf32> to vector<8x128xf32>
    %51 = arith.addf %48, %50 : vector<8x128xf32>
    %c0_32 = arith.constant 0 : index
    %c0_33 = arith.constant 0 : index
    %52 = vector.load %arg6[%c0_32, %c0_33] : memref<8x128xf32, #tpu.memory_space<vmem>>, vector<8x128xf32>
    %53 = arith.subf %52, %51 : vector<8x128xf32>
    %c0_34 = arith.constant 0 : index
    %c0_35 = arith.constant 0 : index
    %54 = vector.load %arg7[%c0_34, %c0_35] : memref<1x128xf32, #tpu.memory_space<vmem>>, vector<1x128xf32>
    %55 = vector.broadcast %54 : vector<1x128xf32> to vector<8x128xf32>
    %56 = arith.mulf %53, %55 : vector<8x128xf32>
    %57 = arith.mulf %56, %56 : vector<8x128xf32>
    %cst_36 = arith.constant -5.000000e-01 : f32
    %58 = vector.broadcast %cst_36 : f32 to vector<8x128xf32>
    %59 = arith.mulf %58, %57 : vector<8x128xf32>
    %c0_37 = arith.constant 0 : index
    %c0_38 = arith.constant 0 : index
    %60 = vector.load %arg8[%c0_37, %c0_38] : memref<1x128xf32, #tpu.memory_space<vmem>>, vector<1x128xf32>
    %61 = vector.broadcast %60 : vector<1x128xf32> to vector<8x128xf32>
    %62 = arith.addf %59, %61 : vector<8x128xf32>
    %c0_39 = arith.constant 0 : index
    %c0_40 = arith.constant 0 : index
    %63 = vector.load %arg9[%c0_39, %c0_40] : memref<8x128xf32, #tpu.memory_space<vmem>>, vector<8x128xf32>
    tpu.vector_store %arg9[%c0_39, %c0_40], %62 {strides = array<i32>} : memref<8x128xf32, #tpu.memory_space<vmem>>, vector<8x128xf32>,
    return
  }
  func.func @transform_0(%arg0: i32) -> (i32, i32) {
    %c0_i32 = arith.constant 0 : i32
    %c0_i32_0 = arith.constant 0 : i32
    return %arg0, %c0_i32 : i32, i32
  }
  func.func @transform_1(%arg0: i32) -> (i32, i32) {
    %c0_i32 = arith.constant 0 : i32
    %c0_i32_0 = arith.constant 0 : i32
    %c0_i32_1 = arith.constant 0 : i32
    return %c0_i32, %c0_i32_0 : i32, i32
  }
  func.func @transform_2(%arg0: i32) -> (i32, i32) {
    %c0_i32 = arith.constant 0 : i32
    %c0_i32_0 = arith.constant 0 : i32
    %c0_i32_1 = arith.constant 0 : i32
    return %c0_i32, %c0_i32_0 : i32, i32
  }
  func.func @transform_3(%arg0: i32) -> (i32, i32) {
    %c0_i32 = arith.constant 0 : i32
    %c0_i32_0 = arith.constant 0 : i32
    %c0_i32_1 = arith.constant 0 : i32
    return %c0_i32, %c0_i32_0 : i32, i32
  }
  func.func @transform_4(%arg0: i32) -> (i32, i32) {
    %c0_i32 = arith.constant 0 : i32
    %c0_i32_0 = arith.constant 0 : i32
    %c0_i32_1 = arith.constant 0 : i32
    return %c0_i32, %c0_i32_0 : i32, i32
  }
  func.func @transform_5(%arg0: i32) -> (i32, i32) {
    %c0_i32 = arith.constant 0 : i32
    %c0_i32_0 = arith.constant 0 : i32
    return %arg0, %c0_i32 : i32, i32
  }
  func.func @transform_6(%arg0: i32) -> (i32, i32) {
    %c0_i32 = arith.constant 0 : i32
    %c0_i32_0 = arith.constant 0 : i32
    %c0_i32_1 = arith.constant 0 : i32
    return %c0_i32, %c0_i32_0 : i32, i32
  }
  func.func @transform_7(%arg0: i32) -> (i32, i32) {
    %c0_i32 = arith.constant 0 : i32
    %c0_i32_0 = arith.constant 0 : i32
    %c0_i32_1 = arith.constant 0 : i32
    return %c0_i32, %c0_i32_0 : i32, i32
  }
  func.func @transform_8(%arg0: i32) -> (i32, i32) {
    %c0_i32 = arith.constant 0 : i32
    %c0_i32_0 = arith.constant 0 : i32
    return %arg0, %c0_i32 : i32, i32
  }
}

</mosaic_0001>

<bundles_post_ra>
// kernel: probabilistic_si_forward.1
= control target key start
LH: loop header
LB: loop body
LE: loop exit
PB: predicated region body
PF: predicated region fallthrough
CT: control target
= control target key end

     0   :  { %13 = vsyncpa [#allocation4], 0  ;;  %s3583_s0 = inlined_call_operand.vmem [shape: f32[256,256], index: 0, kind: input, shape index: {}]   ;;  %s3584_s1 = inlined_call_operand.vmem [shape: f32[256,128], index: 1, kind: input, shape index: {}]   ;;  %s3585_s2 = inlined_call_operand.vmem [shape: f32[1,128], index: 2, kind: input, shape index: {}]   ;;  %s3586_s3 = inlined_call_operand.vmem [shape: f32[2048,128], index: 3, kind: input, shape index: {}]   ;;  %s3587_s4 = inlined_call_operand.vmem [shape: f32[1,128], index: 4, kind: input, shape index: {}]   ;;  %s3588_s5 = inlined_call_operand.vmem [shape: f32[16,128], index: 5, kind: input, shape index: {}]   ;;  %s3589_s6 = inlined_call_operand.vmem [shape: f32[1,128], index: 6, kind: input, shape index: {}]   ;;  %s3590_s7 = inlined_call_operand.vmem [shape: f32[1,128], index: 7, kind: input, shape index: {}]   ;;  %s3591_s8 = inlined_call_operand.hbm [shape: f32[16,128], index: 8, kind: output, shape index: {}]  }
   0x1   :  { %15 = vsyncpa [#allocation4 + $0x1], 0  ;;  %s2462_s27 = smov 0   ;;  %s2464_s28 = smov 0  }
   0x2   :  { %s2466_s29 = smov 0   ;;  %s2468_s30 = smov 0  }
   0x3 LB: > { %s2483_s9 = sadd.s32 4294967295, %s2414_s30   ;;  %s1599_s10 = sadd.s32 4294967294, %s2414_s30   ;;  %s2414_s30 = sphi %s2468_s30, %s3597_s30   ;;  %s2410_s29 = sphi %s2466_s29, %s3596_s29   ;;  %s2406_s28 = sphi %s2464_s28, %s3595_s28   ;;  %s2402_s27 = sphi %s2462_s27, %s3594_s27  }
   0x4   : > { %s2487_s11 = sadd.s32 1, %s2414_s30   ;;  %s206_s12 = sadd.s32 1, %s2410_s29 }
   0x5   : > { %s203_s13 = ssub.s32 %s2414_s30, %s2487_s11  ;;  %p216_p0 = scmp.ne.s32.totalorder %s2410_s29, %s2406_s28 }
   0x6   : > { %p204_p1 = scmp.eq.s32.totalorder %s203_s13, 0  ;;  %p217_p2 = scmp.eq.s32.totalorder %s2483_s9, 1 }
   0x7   : > { %p222_p3 = scmp.ne.s32.totalorder %s2406_s28, %s2402_s27  ;;  %p223_p4 = scmp.eq.s32.totalorder %s1599_s10, 1 }
   0x8   : > { %s2498_s14 = scalar_select %p204_p1, %s2410_s29, %s206_s12  }
   0x9   : > { %p2500_p5 = por %p217_p2, %p216_p0  ;;  %p2504_p6 = por %p223_p4, %p222_p3 }
   0xa   : > { %p1602_p7 = scmp.ge.s32.totalorder %s2414_s30, 1  ;;  %p276_p8 = scmp.lt.s32.totalorder %s2414_s30, 3 }
   0xc   : > { %p277_p9 = pnand %p1602_p7, %p276_p8 }
   0xd   : > { %v374_v0 = vld [vmem:[%s3584_s1 + $0x80] sm:$0xff] (!%p277_p9)  ;;  %v375_v1 = vld [vmem:[%s3584_s1 + $0x88] sm:$0xff] (!%p277_p9)  ;;  %s1604_s23 = sshll.u32 (!%p277_p9), %s2483_s9, 4  ;;  %v376_v5 = vld [vmem:[%s3584_s1 + $0x90] sm:$0xff] (!%p277_p9)  ;;  %p322_p11 = scmp.lt.s32.totalorder (!%p277_p9), %s2483_s9, 1 }
   0xe   : > { %280 = sbr.rel (%p277_p9) target bundleno = 657 (0x291), region = 52  ;;  %v358_v2 = vld [vmem:[%s3584_s1] sm:$0xff] (!%p277_p9)  ;;  %v1993_v3 = vpack.c.bf16 (!%p277_p9), %v375_v1, %v374_v0  ;;  %v359_v4 = vld [vmem:[%s3584_s1 + $0x8] sm:$0xff] (!%p277_p9)  ;;  %v377_v6 = vld [vmem:[%s3584_s1 + $0x98] sm:$0xff] (!%p277_p9)  ;;  %p316_p10 = scmp.lt.s32.totalorder (!%p277_p9), %s1604_s23, 31 }
   0xf   : > { %v1995_v7 = vpack.c.bf16 (!%p277_p9), %v359_v4, %v358_v2  ;;  %v1997_v8 = vpack.c.bf16 (!%p277_p9), %v377_v6, %v376_v5  ;;  %v360_v9 = vld [vmem:[%s3584_s1 + $0x10] sm:$0xff] (!%p277_p9)  ;;  %v361_v10 = vld [vmem:[%s3584_s1 + $0x18] sm:$0xff] (!%p277_p9)  ;;  %v378_v11 = vld [vmem:[%s3584_s1 + $0xa0] sm:$0xff] (!%p277_p9)  ;;  %s312_s10 = sand.u32 (!%p277_p9), 1, %s2406_s28  }
  0x10   : > { %1994 = vmatprep.subr.bf16.mxu0 (!%p277_p9), %v1993_v3  ;;  %v379_v12 = vld [vmem:[%s3584_s1 + $0xa8] sm:$0xff] (!%p277_p9)  ;;  %v1999_v13 = vpack.c.bf16 (!%p277_p9), %v361_v10, %v360_v9  ;;  %v362_v15 = vld [vmem:[%s3584_s1 + $0x20] sm:$0xff] (!%p277_p9)  ;;  %v380_v17 = vld [vmem:[%s3584_s1 + $0xb0] sm:$0xff] (!%p277_p9)  ;;  %s1603_s13 = sshll.u32 (!%p277_p9), %s312_s10, 3 }
  0x11   : > { %1996 = vmatpush3.bf16.msra.mxu0 (!%p277_p9), %v1995_v7  ;;  %v2001_v14 = vpack.c.bf16 (!%p277_p9), %v379_v12, %v378_v11  ;;  %v363_v16 = vld [vmem:[%s3584_s1 + $0x28] sm:$0xff] (!%p277_p9)  ;;  %v381_v18 = vld [vmem:[%s3584_s1 + $0xb8] sm:$0xff] (!%p277_p9)  ;;  %v364_v21 = vld [vmem:[%s3584_s1 + $0x30] sm:$0xff] (!%p277_p9)  ;;  %s314_s20 = scalar_lea.vmem (!%p277_p9), [#allocation3], %s1603_s13 }
  0x12   : > { %1998 = vmatprep.subr.bf16.mxu0 (!%p277_p9), %v1997_v8  ;;  %v2003_v19 = vpack.c.bf16 (!%p277_p9), %v363_v16, %v362_v15  ;;  %v2005_v20 = vpack.c.bf16 (!%p277_p9), %v381_v18, %v380_v17  ;;  %v365_v22 = vld [vmem:[%s3584_s1 + $0x38] sm:$0xff] (!%p277_p9)  ;;  %v382_v23 = vld [vmem:[%s3584_s1 + $0xc0] sm:$0xff] (!%p277_p9)  ;;  %v383_v24 = vld [vmem:[%s3584_s1 + $0xc8] sm:$0xff] (!%p277_p9) }
  0x13   : > { %v2007_v26 = vpack.c.bf16 (!%p277_p9), %v365_v22, %v364_v21  ;;  %v2009_v27 = vpack.c.bf16 (!%p277_p9), %v383_v24, %v382_v23  ;;  %v366_v28 = vld [vmem:[%s3584_s1 + $0x40] sm:$0xff] (!%p277_p9)  ;;  %v367_v29 = vld [vmem:[%s3584_s1 + $0x48] sm:$0xff] (!%p277_p9)  ;;  %v384_v30 = vld [vmem:[%s3584_s1 + $0xd0] sm:$0xff] (!%p277_p9) }
  0x14   : > { %v385_v31 = vld [vmem:[%s3584_s1 + $0xd8] sm:$0xff] (!%p277_p9)  ;;  %v2011_v32 = vpack.c.bf16 (!%p277_p9), %v367_v29, %v366_v28  ;;  %v368_v34 = vld [vmem:[%s3584_s1 + $0x50] sm:$0xff] (!%p277_p9)  ;;  %v386_v36 = vld [vmem:[%s3584_s1 + $0xe0] sm:$0xff] (!%p277_p9) }
  0x15   : > { %s3599_s23 = smov (!%p316_p10, %s1604_s23), 31  ;;  %2000 = vmatpush3.bf16.msra.mxu0 %v1999_v13  ;;  %v2013_v33 = vpack.c.bf16 %v385_v31, %v384_v30  ;;  %v369_v35 = vld [vmem:[%s3584_s1 + $0x58] sm:$0xff]  ;;  %v387_v37 = vld [vmem:[%s3584_s1 + $0xe8] sm:$0xff]  ;;  %v370_v39 = vld [vmem:[%s3584_s1 + $0x60] sm:$0xff] }
  0x16   : > { %s1632_s17 = sshll.u32 %s3599_s23, 4  ;;  %2002 = vmatprep.subr.bf16.mxu0 %v2001_v14  ;;  %v2015_v38 = vpack.c.bf16 %v369_v35, %v368_v34  ;;  %v371_v40 = vld [vmem:[%s3584_s1 + $0x68] sm:$0xff]  ;;  %v2017_v41 = vpack.c.bf16 %v387_v37, %v386_v36  ;;  %v388_v42 = vld [vmem:[%s3584_s1 + $0xf0] sm:$0xff]  ;;  %v686_v43 = vld [vmem:[%s3586_s3 + $0x80] sm:$0xff] }
  0x17   : > { %s2556_s25 = scalar_lea.vmem %s3583_s0, %s1632_s17  ;;  %v687_v44 = vld [vmem:[%s3586_s3 + $0x88] sm:$0xff]  ;;  %v389_v45 = vld [vmem:[%s3584_s1 + $0xf8] sm:$0xff]  ;;  %v670_v47 = vld [vmem:[%s3586_s3] sm:$0xff]  ;;  %v2019_v50 = vpack.c.bf16 %v371_v40, %v370_v39  ;;  %s1629_s17 = sshll.u32 %s2483_s9, 7 }
  0x18   : > { %v327_v25 = vld [vmem:[%s2556_s25 + $0x8] sm:$0xff]  ;;  %v2025_v46 = vpack.c.bf16 %v687_v44, %v686_v43  ;;  %v2021_v51 = vpack.c.bf16 %v389_v45, %v388_v42  ;;  %v372_v52 = vld [vmem:[%s3584_s1 + $0x70] sm:$0xff]  ;;  %v373_v53 = vld [vmem:[%s3584_s1 + $0x78] sm:$0xff]  ;;  %s323_s21 = scalar_select %p322_p11, %s2483_s9, 1 }
  0x19   : > { %461 = vmatprep.mubr.f32.mxu0 %v327_v25  ;;  %2004 = vmatpush3.bf16.msra.mxu0 %v2003_v19  ;;  %v671_v48 = vld [vmem:[%s3586_s3 + $0x8] sm:$0xff]  ;;  %v2023_v54 = vpack.c.bf16 %v373_v53, %v372_v52  ;;  %v326_v55 = vld [vmem:[%s2556_s25] sm:$0xff]  ;;  %v329_v56 = vld [vmem:[%s2556_s25 + $0x18] sm:$0xff]  ;;  %s3541_s26 = scalar_lea.hbm %s3591_s8, %s1629_s17  ;;  %s2416_s9 = smov [#allocation3]  }
  0x1a   : > { %2006 = vmatprep.subr.bf16.mxu0 %v2005_v20  ;;  %v2027_v49 = vpack.c.bf16 %v671_v48, %v670_v47  ;;  %2026 = vmatprep.subr.bf16.mxu1 %v2025_v46  ;;  %v328_v57 = vld [vmem:[%s2556_s25 + $0x10] sm:$0xff]  ;;  %v331_v58 = vld [vmem:[%s2556_s25 + $0x28] sm:$0xff]  ;;  %v330_v59 = vld [vmem:[%s2556_s25 + $0x20] sm:$0xff]  ;;  %s1607_s22 = sshll.u32 %s323_s21, 3  ;;  %s1528_s21 = sshll.u32 %s314_s20, 4  ;;  %s3543_s21 = int_to_ptr.vmem [resolvable:$true] %s1528_s21 }
  0x1b   : > { %v333_v60 = vld [vmem:[%s2556_s25 + $0x38] sm:$0xff]  ;;  %v332_v61 = vld [vmem:[%s2556_s25 + $0x30] sm:$0xff]  ;;  %v335_v62 = vld [vmem:[%s2556_s25 + $0x48] sm:$0xff]  ;;  %s325_s23 = scalar_lea.vmem %s3588_s5, %s1607_s22  ;;  %s2352_s12 = scalar_lea.vmem %s3543_s21, 128 }
  0x1c   : > { %2028 = vmatpush3.bf16.msra.mxu1 %v2027_v49  ;;  %v334_v63 = vld [vmem:[%s2556_s25 + $0x40] sm:$0xff]  ;;  %v337_v0 = vld [vmem:[%s2556_s25 + $0x58] sm:$0xff]  ;;  %v336_v1 = vld [vmem:[%s2556_s25 + $0x50] sm:$0xff]  ;;  %p2353_p12 = scmp.ne.s32.totalorder %s3543_s21, %s2352_s12 }
  0x1d   : > { %2008 = vmatpush3.bf16.msra.mxu0 %v2007_v26  ;;  %v339_v2 = vld [vmem:[%s2556_s25 + $0x68] sm:$0xff]  ;;  %v338_v3 = vld [vmem:[%s2556_s25 + $0x60] sm:$0xff]  ;;  %v341_v4 = vld [vmem:[%s2556_s25 + $0x78] sm:$0xff] }
  0x1e   : > { %2010 = vmatprep.subr.bf16.mxu0 %v2009_v27  ;;  %v340_v5 = vld [vmem:[%s2556_s25 + $0x70] sm:$0xff]  ;;  %v343_v6 = vld [vmem:[%s2556_s25 + $0x88] sm:$0xff]  ;;  %v342_v7 = vld [vmem:[%s2556_s25 + $0x80] sm:$0xff]  ;;  %p2354_p13 = pnand %p2353_p12, %p2500_p5 }
  0x1f   : > { %v345_v8 = vld [vmem:[%s2556_s25 + $0x98] sm:$0xff]  ;;  %v344_v9 = vld [vmem:[%s2556_s25 + $0x90] sm:$0xff]  ;;  %v347_v10 = vld [vmem:[%s2556_s25 + $0xa8] sm:$0xff] }
  0x20   : > { %v346_v11 = vld [vmem:[%s2556_s25 + $0xa0] sm:$0xff]  ;;  %v349_v12 = vld [vmem:[%s2556_s25 + $0xb8] sm:$0xff]  ;;  %v348_v13 = vld [vmem:[%s2556_s25 + $0xb0] sm:$0xff]  ;;  %p2355_p0 = pneg %p2354_p13 }
  0x21   : > { %2012 = vmatpush3.bf16.msra.mxu0 %v2011_v32  ;;  %v351_v14 = vld [vmem:[%s2556_s25 + $0xc8] sm:$0xff]  ;;  %v350_v15 = vld [vmem:[%s2556_s25 + $0xc0] sm:$0xff]  ;;  %v353_v16 = vld [vmem:[%s2556_s25 + $0xd8] sm:$0xff] }
  0x22   : > { %2014 = vmatprep.subr.bf16.mxu0 %v2013_v33  ;;  %v352_v17 = vld [vmem:[%s2556_s25 + $0xd0] sm:$0xff]  ;;  %v355_v18 = vld [vmem:[%s2556_s25 + $0xe8] sm:$0xff]  ;;  %v354_v19 = vld [vmem:[%s2556_s25 + $0xe0] sm:$0xff] }
  0x23   : > { %v357_v20 = vld [vmem:[%s2556_s25 + $0xf8] sm:$0xff]  ;;  %v356_v21 = vld [vmem:[%s2556_s25 + $0xf0] sm:$0xff]  ;;  %v690_v28 = vld [vmem:[%s3586_s3 + $0xa0] sm:$0xff]  ;;  %s2356_s25 = sshll.u32 %s2416_s9, 4  ;;  %s2357_s25 = int_to_ptr.vmem [resolvable:$false] %s2356_s25 }
  0x24   : > { %v688_v22 = vld [vmem:[%s3586_s3 + $0x90] sm:$0xff]  ;;  %v689_v23 = vld [vmem:[%s3586_s3 + $0x98] sm:$0xff]  ;;  %v691_v29 = vld [vmem:[%s3586_s3 + $0xa8] sm:$0xff]  ;;  %s2358_s13 = scalar_lea.vmem %s2357_s25, 256  ;;  %p2359_p1 = scmp.lt.s32.totalorder %s3543_s21, %s2357_s25 }
  0x25   : > { %2016 = vmatpush3.bf16.msra.mxu0 %v2015_v38  ;;  %v2029_v24 = vpack.c.bf16 %v689_v23, %v688_v22  ;;  %v672_v25 = vld [vmem:[%s3586_s3 + $0x10] sm:$0xff]  ;;  %v673_v26 = vld [vmem:[%s3586_s3 + $0x18] sm:$0xff]  ;;  %v2033_v30 = vpack.c.bf16 %v691_v29, %v690_v28  ;;  %v674_v31 = vld [vmem:[%s3586_s3 + $0x20] sm:$0xff]  ;;  %p2360_p2 = scmp.lt.s32.totalorder %s2358_s13, %s2352_s12 }
  0x26   : > { %2018 = vmatprep.subr.bf16.mxu0 %v2017_v41  ;;  %v2031_v27 = vpack.c.bf16 %v673_v26, %v672_v25  ;;  %v675_v32 = vld [vmem:[%s3586_s3 + $0x28] sm:$0xff]  ;;  %v692_v34 = vld [vmem:[%s3586_s3 + $0xb0] sm:$0xff]  ;;  %v693_v35 = vld [vmem:[%s3586_s3 + $0xb8] sm:$0xff] }
  0x27   : > { %2030 = vmatprep.subr.bf16.mxu1 %v2029_v24  ;;  %v2035_v33 = vpack.c.bf16 %v675_v32, %v674_v31  ;;  %v2037_v36 = vpack.c.bf16 %v693_v35, %v692_v34  ;;  %v676_v37 = vld [vmem:[%s3586_s3 + $0x30] sm:$0xff]  ;;  %v677_v38 = vld [vmem:[%s3586_s3 + $0x38] sm:$0xff]  ;;  %v694_v40 = vld [vmem:[%s3586_s3 + $0xc0] sm:$0xff]  ;;  %p2361_p3 = por %p2360_p2, %p2359_p1 }
  0x28   : > { %2032 = vmatpush3.bf16.msra.mxu1 %v2031_v27  ;;  %v2039_v39 = vpack.c.bf16 %v677_v38, %v676_v37  ;;  %v695_v41 = vld [vmem:[%s3586_s3 + $0xc8] sm:$0xff]  ;;  %v678_v43 = vld [vmem:[%s3586_s3 + $0x40] sm:$0xff]  ;;  %v696_v46 = vld [vmem:[%s3586_s3 + $0xd0] sm:$0xff] }
  0x29   : > { %2020 = vmatpush3.bf16.msra.mxu0 %v2019_v50  ;;  %2034 = vmatprep.subr.bf16.mxu1 %v2033_v30  ;;  %v2041_v42 = vpack.c.bf16 %v695_v41, %v694_v40  ;;  %v679_v44 = vld [vmem:[%s3586_s3 + $0x48] sm:$0xff]  ;;  %v697_v47 = vld [vmem:[%s3586_s3 + $0xd8] sm:$0xff]  ;;  %v680_v49 = vld [vmem:[%s3586_s3 + $0x50] sm:$0xff]  ;;  %p2362_p4 = pnand %p2361_p3, %p2355_p0 }
  0x2a   : > { %2022 = vmatprep.subr.bf16.mxu0 %v2021_v51  ;;  %v2043_v45 = vpack.c.bf16 %v679_v44, %v678_v43  ;;  %v2045_v48 = vpack.c.bf16 %v697_v47, %v696_v46  ;;  %v681_v50 = vld [vmem:[%s3586_s3 + $0x58] sm:$0xff]  ;;  %v698_v52 = vld [vmem:[%s3586_s3 + $0xe0] sm:$0xff]  ;;  %v699_v53 = vld [vmem:[%s3586_s3 + $0xe8] sm:$0xff] }
  0x2b   : > { %v2047_v51 = vpack.c.bf16 %v681_v50, %v680_v49  ;;  %v757_v22 = vld [vmem:[%s3586_s3 + $0x2b8] sm:$0xff]  ;;  %v740_v24 = vld [vmem:[%s3586_s3 + $0x230] sm:$0xff]  ;;  %v758_v27 = vld [vmem:[%s3586_s3 + $0x2c0] sm:$0xff] }
  0x2c   : > { %2036 = vmatpush3.bf16.msra.mxu1 %v2035_v33  ;;  %v741_v25 = vld [vmem:[%s3586_s3 + $0x238] sm:$0xff]  ;;  %v759_v28 = vld [vmem:[%s3586_s3 + $0x2c8] sm:$0xff]  ;;  %v742_v30 = vld [vmem:[%s3586_s3 + $0x240] sm:$0xff] }
  0x2d   : > { %2024 = vmatpush3.bf16.msra.mxu0 %v2023_v54  ;;  %2038 = vmatprep.subr.bf16.mxu1 %v2037_v36  ;;  %v2049_v54 = vpack.c.bf16 %v699_v53, %v698_v52  ;;  %v2103_v26 = vpack.c.bf16 %v741_v25, %v740_v24  ;;  %v2105_v29 = vpack.c.bf16 %v759_v28, %v758_v27  ;;  %v743_v31 = vld [vmem:[%s3586_s3 + $0x248] sm:$0xff]  ;;  %v760_v33 = vld [vmem:[%s3586_s3 + $0x2d0] sm:$0xff]  ;;  %v761_v34 = vld [vmem:[%s3586_s3 + $0x2d8] sm:$0xff] }
  0x2e   : > { %v2107_v32 = vpack.c.bf16 %v743_v31, %v742_v30  ;;  %v2109_v35 = vpack.c.bf16 %v761_v34, %v760_v33  ;;  %v744_v36 = vld [vmem:[%s3586_s3 + $0x250] sm:$0xff]  ;;  %v745_v37 = vld [vmem:[%s3586_s3 + $0x258] sm:$0xff]  ;;  %v763_v40 = vld [vmem:[%s3586_s3 + $0x2e8] sm:$0xff] }
  0x2f   : > { %v2111_v38 = vpack.c.bf16 %v745_v37, %v744_v36  ;;  %v747_v43 = vld [vmem:[%s3586_s3 + $0x268] sm:$0xff]  ;;  %v765_v46 = vld [vmem:[%s3586_s3 + $0x2f8] sm:$0xff]  ;;  %v720_v25 = vld [vmem:[%s3586_s3 + $0x190] sm:$0xff] }
  0x30   : > { %462 = vmatmul.mubr.f32.vlgmr.msra.gmra.mrb[0].mxu0 %v326_v55  ;;  %2040 = vmatpush3.bf16.msra.mxu1 %v2039_v39  ;;  %v682_v55 = vld [vmem:[%s3586_s3 + $0x60] sm:$0xff]  ;;  %v749_v49 = vld [vmem:[%s3586_s3 + $0x278] sm:$0xff]  ;;  %v815_v52 = vld [vmem:[%s3586_s3 + $0x488] sm:$0xff] }
  0x31   : > { %466 = vmatprep.mubr.f32.mxu0 %v329_v56  ;;  %2042 = vmatprep.subr.bf16.mxu1 %v2041_v42  ;;  %v683_v56 = vld [vmem:[%s3586_s3 + $0x68] sm:$0xff]  ;;  %v762_v39 = vld [vmem:[%s3586_s3 + $0x2e0] sm:$0xff]  ;;  %v704_v37 = vld [vmem:[%s3586_s3 + $0x110] sm:$0xff] }
  0x32   : > { %v2113_v41 = vpack.c.bf16 %v763_v40, %v762_v39  ;;  %v746_v42 = vld [vmem:[%s3586_s3 + $0x260] sm:$0xff] }
  0x33   : > { %v2115_v44 = vpack.c.bf16 %v747_v43, %v746_v42  ;;  %v722_v40 = vld [vmem:[%s3586_s3 + $0x1a0] sm:$0xff] }
  0x34   : > { %467 = vmatmul.mubr.f32.gmra.mrb[2].mxu0 %v328_v57  ;;  %2044 = vmatpush3.bf16.msra.mxu1 %v2043_v45  ;;  %v2051_v57 = vpack.c.bf16 %v683_v56, %v682_v55  ;;  %v764_v45 = vld [vmem:[%s3586_s3 + $0x2f0] sm:$0xff]  ;;  %v2851_v55 = vld [vmem:[%s3585_s2] ss:$0 sm:$0xff] }
  0x35   : > { %471 = vmatprep.mubr.f32.mxu0 %v331_v58  ;;  %2046 = vmatprep.subr.bf16.mxu1 %v2045_v48  ;;  %v700_v58 = vld [vmem:[%s3586_s3 + $0xf0] sm:$0xff]  ;;  %v2117_v47 = vpack.c.bf16 %v765_v46, %v764_v45 }
  0x36   : > { %v748_v48 = vld [vmem:[%s3586_s3 + $0x270] sm:$0xff] }
  0x37   : > { %v2119_v50 = vpack.c.bf16 %v749_v49, %v748_v48 }
  0x38   : > { %472 = vmatmul.mubr.f32.gmra.mrb[4].mxu0 %v330_v59  ;;  %2048 = vmatpush3.bf16.msra.mxu1 %v2047_v51  ;;  %v701_v59 = vld [vmem:[%s3586_s3 + $0xf8] sm:$0xff]  ;;  %v814_v51 = vld [vmem:[%s3586_s3 + $0x480] sm:$0xff] }
  0x39   : > { %476 = vmatprep.mubr.f32.mxu0 %v333_v60  ;;  %2050 = vmatprep.subr.bf16.mxu1 %v2049_v54  ;;  %v2053_v60 = vpack.c.bf16 %v701_v59, %v700_v58  ;;  %v2153_v53 = vpack.c.bf16 %v815_v52, %v814_v51  ;;  %v707_v51 = vld [vmem:[%s3586_s3 + $0x128] sm:$0xff] }
  0x3c   : > { %477 = vmatmul.mubr.f32.gmra.mrb[6].mxu0 %v332_v61  ;;  %2052 = vmatpush3.bf16.msra.mxu1 %v2051_v57  ;;  %v684_v61 = vld [vmem:[%s3586_s3 + $0x70] sm:$0xff] }
  0x3d   : > { %481 = vmatprep.mubr.f32.mxu0 %v335_v62  ;;  %v685_v62 = vld [vmem:[%s3586_s3 + $0x78] sm:$0xff]  ;;  %2054 = vmatprep.subr.bf16.mxu1 %v2053_v60 }
  0x40   : > { %482 = vmatmul.mubr.f32.gmra.mrb[8].mxu0 %v334_v63  ;;  %v750_v63 = vld [vmem:[%s3586_s3 + $0x280] sm:$0xff] }
  0x41   : > { %486 = vmatprep.mubr.f32.mxu0 %v337_v0  ;;  %v2055_v0 = vpack.c.bf16 %v685_v62, %v684_v61 }
  0x43   : > { %2056 = vmatpush3.bf16.msra.mxu1 %v2055_v0 }
  0x44   : > { %487 = vmatmul.mubr.f32.gmra.mrb[10].mxu0 %v336_v1  ;;  %v751_v1 = vld [vmem:[%s3586_s3 + $0x288] sm:$0xff] }
  0x45   : > { %491 = vmatprep.mubr.f32.mxu0 %v339_v2  ;;  %v734_v2 = vld [vmem:[%s3586_s3 + $0x200] sm:$0xff] }
  0x48   : > { %492 = vmatmul.mubr.f32.gmra.mrb[12].mxu0 %v338_v3  ;;  %v735_v3 = vld [vmem:[%s3586_s3 + $0x208] sm:$0xff] }
  0x49   : > { %496 = vmatprep.mubr.f32.mxu0 %v341_v4  ;;  %v2089_v4 = vpack.c.bf16 %v751_v1, %v750_v63 }
  0x4b   : > { %2090 = vmatprep.subr.bf16.mxu0 %v2089_v4 }
  0x4c   : > { %497 = vmatmul.mubr.f32.gmra.mrb[14].mxu0 %v340_v5  ;;  %v2091_v5 = vpack.c.bf16 %v735_v3, %v734_v2 }
  0x4d   : > { %501 = vmatprep.mubr.f32.mxu0 %v343_v6  ;;  %v718_v6 = vld [vmem:[%s3586_s3 + $0x180] sm:$0xff] }
  0x4e   : > { %2092 = vmatpush3.bf16.msra.mxu0 %v2091_v5 }
  0x50   : > { %502 = vmatmul.mubr.f32.gmra.mrb[16].mxu0 %v342_v7  ;;  %v719_v7 = vld [vmem:[%s3586_s3 + $0x188] sm:$0xff] }
  0x51   : > { %506 = vmatprep.mubr.f32.mxu0 %v345_v8  ;;  %v2057_v8 = vpack.c.bf16 %v719_v7, %v718_v6 }
  0x53   : > { %2058 = vmatprep.subr.bf16.mxu1 %v2057_v8 }
  0x54   : > { %507 = vmatmul.mubr.f32.gmra.mrb[18].mxu0 %v344_v9  ;;  %v752_v9 = vld [vmem:[%s3586_s3 + $0x290] sm:$0xff] }
  0x55   : > { %511 = vmatprep.mubr.f32.mxu0 %v347_v10  ;;  %v753_v10 = vld [vmem:[%s3586_s3 + $0x298] sm:$0xff] }
  0x58   : > { %512 = vmatmul.mubr.f32.gmra.mrb[20].mxu0 %v346_v11  ;;  %v2093_v11 = vpack.c.bf16 %v753_v10, %v752_v9 }
  0x59   : > { %516 = vmatprep.mubr.f32.mxu0 %v349_v12  ;;  %v736_v12 = vld [vmem:[%s3586_s3 + $0x210] sm:$0xff] }
  0x5a   : > { %2094 = vmatprep.subr.bf16.mxu0 %v2093_v11 }
  0x5c   : > { %517 = vmatmul.mubr.f32.gmra.mrb[22].mxu0 %v348_v13  ;;  %v737_v13 = vld [vmem:[%s3586_s3 + $0x218] sm:$0xff] }
  0x5d   : > { %521 = vmatprep.mubr.f32.mxu0 %v351_v14  ;;  %v2095_v14 = vpack.c.bf16 %v737_v13, %v736_v12 }
  0x5f   : > { %2096 = vmatpush3.bf16.msra.mxu0 %v2095_v14 }
  0x60   : > { %522 = vmatmul.mubr.f32.gmra.mrb[24].mxu0 %v350_v15  ;;  %v754_v15 = vld [vmem:[%s3586_s3 + $0x2a0] sm:$0xff] }
  0x61   : > { %526 = vmatprep.mubr.f32.mxu0 %v353_v16  ;;  %v755_v16 = vld [vmem:[%s3586_s3 + $0x2a8] sm:$0xff] }
  0x64   : > { %527 = vmatmul.mubr.f32.gmra.mrb[26].mxu0 %v352_v17  ;;  %v2097_v17 = vpack.c.bf16 %v755_v16, %v754_v15 }
  0x65   : > { %531 = vmatprep.mubr.f32.mxu0 %v355_v18  ;;  %v738_v18 = vld [vmem:[%s3586_s3 + $0x220] sm:$0xff] }
  0x66   : > { %2098 = vmatprep.subr.bf16.mxu0 %v2097_v17 }
  0x68   : > { %532 = vmatmul.mubr.f32.gmra.mrb[28].mxu0 %v354_v19  ;;  %v739_v19 = vld [vmem:[%s3586_s3 + $0x228] sm:$0xff] }
  0x69   : > { %536 = vmatprep.mubr.f32.mxu0 %v357_v20  ;;  %v2099_v20 = vpack.c.bf16 %v739_v19, %v738_v18  ;;  %v702_v19 = vld [vmem:[%s3586_s3 + $0x100] sm:$0xff] }
  0x6b   : > { %2100 = vmatpush3.bf16.msra.mxu0 %v2099_v20  ;;  %v703_v20 = vld [vmem:[%s3586_s3 + $0x108] sm:$0xff] }
  0x6c   : > { %537 = vmatmul.mubr.f32.gmra.mrb[30].mxu0 %v356_v21  ;;  %v756_v21 = vld [vmem:[%s3586_s3 + $0x2b0] sm:$0xff]  ;;  %v2059_v31 = vpack.c.bf16 %v703_v20, %v702_v19 }
  0x6d   : > { %v2101_v23 = vpack.c.bf16 %v757_v22, %v756_v21  ;;  %v728_v20 = vld [vmem:[%s3586_s3 + $0x1d0] sm:$0xff] }
  0x6f   : > { %2102 = vmatprep.subr.bf16.mxu0 %v2101_v23 }
  0x70   : > { %2104 = vmatpush3.bf16.msra.mxu0 %v2103_v26  ;;  %v721_v26 = vld [vmem:[%s3586_s3 + $0x198] sm:$0xff] }
  0x71   : > { %2106 = vmatprep.subr.bf16.mxu0 %v2105_v29  ;;  %v2061_v36 = vpack.c.bf16 %v721_v26, %v720_v25 }
  0x74   : > { %2108 = vmatpush3.bf16.msra.mxu0 %v2107_v32 }
  0x75   : > { %2110 = vmatprep.subr.bf16.mxu0 %v2109_v35 }
  0x78   : > { %2112 = vmatpush3.bf16.msra.mxu0 %v2111_v38  ;;  %v705_v38 = vld [vmem:[%s3586_s3 + $0x118] sm:$0xff] }
  0x79   : > { %2114 = vmatprep.subr.bf16.mxu0 %v2113_v41  ;;  %v723_v41 = vld [vmem:[%s3586_s3 + $0x1a8] sm:$0xff]  ;;  %v2063_v46 = vpack.c.bf16 %v705_v38, %v704_v37  ;;  %v730_v38 = vld [vmem:[%s3586_s3 + $0x1e0] sm:$0xff] }
  0x7a   : > { %v2065_v49 = vpack.c.bf16 %v723_v41, %v722_v40  ;;  %v800_v41 = vld [vmem:[%s3586_s3 + $0x410] sm:$0xff] }
  0x7c   : > { %2116 = vmatpush3.bf16.msra.mxu0 %v2115_v44 }
  0x7d   : > { %2118 = vmatprep.subr.bf16.mxu0 %v2117_v47 }
  0x80   : > { %2120 = vmatpush3.bf16.msra.mxu0 %v2119_v50  ;;  %v706_v50 = vld [vmem:[%s3586_s3 + $0x120] sm:$0xff] }
  0x81   : > { %2154 = vmatprep.subr.bf16.mxu0 %v2153_v53  ;;  %v724_v53 = vld [vmem:[%s3586_s3 + $0x1b0] sm:$0xff] }
 0x103   : > { %v1665_v54 = vpop.f32.mrb[0].mxu0 }
 0x104   : > { %v1666_v56 = vpop.f32.mrb[1].mxu0 }
 0x105   : > { %v1667_v57 = vadd.f32 %v1666_v56, %v1665_v54  ;;  %v725_v54 = vld [vmem:[%s3586_s3 + $0x1b8] sm:$0xff] }
 0x107   : > { %v464_v58 = vadd.f32 %v1667_v57, %v2851_v55  ;;  %v1668_v59 = vpop.f32.mrb[2].mxu0 }
 0x108   : > { %v1669_v60 = vpop.f32.mrb[3].mxu0 }
 0x109   : > { %v558_v61 = vmin.f32 %v464_v58, 0.0  ;;  %v1670_v62 = vadd.f32 %v1669_v60, %v1668_v59  ;;  %vm542_vm1 = vcmp.gt.f32.partialorder %v464_v58, 0.0  ;;  %v2067_v60 = vpack.c.bf16 %v707_v51, %v706_v50  ;;  %v714_v51 = vld [vmem:[%s3586_s3 + $0x160] sm:$0xff] }
 0x10b   : > { %v574_v63 = vmul.f32 1.442695, %v558_v61  ;;  %v469_v0 = vadd.f32 %v1670_v62, %v2851_v55  ;;  %v1671_v1 = vpop.f32.mrb[4].mxu0 }
 0x10c   : > { %v1672_v2 = vpop.f32.mrb[5].mxu0 }
 0x10d   : > { %v559_v3 = vmin.f32 %v469_v0, 0.0  ;;  %v1673_v4 = vadd.f32 %v1672_v2, %v1671_v1  ;;  %2320 = vpow2.f32 %v574_v63  ;;  %vm543_vm0 = vcmp.gt.f32.partialorder %v469_v0, 0.0  ;;  %v708_v1 = vld [vmem:[%s3586_s3 + $0x130] sm:$0xff]  ;;  %v709_v2 = vld [vmem:[%s3586_s3 + $0x138] sm:$0xff] }
 0x10f   : > { %v1674_v5 = vpop.f32.mrb[6].mxu0  ;;  %v576_v6 = vmul.f32 1.442695, %v559_v3  ;;  %v2895_v48 = vadd.f32 %v1673_v4, %v2851_v55 }
 0x110   : > { %v1675_v7 = vpop.f32.mrb[7].mxu0 }
 0x111   : > { %v1676_v8 = vadd.f32 %v1675_v7, %v1674_v5  ;;  %2322 = vpow2.f32 %v576_v6  ;;  %v560_v63 = vmin.f32 %v2895_v48, 0.0  ;;  %v726_v5 = vld [vmem:[%s3586_s3 + $0x1c0] sm:$0xff]  ;;  %v727_v6 = vld [vmem:[%s3586_s3 + $0x1c8] sm:$0xff]  ;;  %vm544_vm7 = vcmp.gt.f32.partialorder %v2895_v48, 0.0 }
 0x112   : > { %v2073_v19 = vpack.c.bf16 %v727_v6, %v726_v5  ;;  %v716_v6 = vld [vmem:[%s3586_s3 + $0x170] sm:$0xff] }
 0x113   : > { %v2856_v9 = vadd.f32 %v1676_v8, %v2851_v55  ;;  %v1677_v10 = vpop.f32.mrb[8].mxu0  ;;  %v710_v8 = vld [vmem:[%s3586_s3 + $0x140] sm:$0xff] }
 0x114   : > { %v1678_v11 = vpop.f32.mrb[9].mxu0 }
 0x115   : > { %v561_v12 = vmin.f32 %v2856_v9, 0.0  ;;  %v1679_v13 = vadd.f32 %v1678_v11, %v1677_v10  ;;  %vm545_vm2 = vcmp.gt.f32.partialorder %v2856_v9, 0.0  ;;  %v2071_v11 = vpack.c.bf16 %v709_v2, %v708_v1  ;;  %v821_v1 = vld [vmem:[%s3586_s3 + $0x4b8] sm:$0xff] }
 0x117   : > { %v580_v14 = vmul.f32 1.442695, %v561_v12  ;;  %v2860_v15 = vadd.f32 %v1679_v13, %v2851_v55  ;;  %v1680_v16 = vpop.f32.mrb[10].mxu0  ;;  %v2321_v17 = vpop.eup %2320 }
 0x118   : > { %v1681_v18 = vpop.f32.mrb[11].mxu0  ;;  %v1609_v24 = vadd.f32 -1.0, %v2321_v17 }
 0x119   : > { %2324 = vpow2.f32 %v580_v14  ;;  %v562_v21 = vmin.f32 %v2860_v15, 0.0  ;;  %v1682_v22 = vadd.f32 %v1681_v18, %v1680_v16  ;;  %v798_v14 = vld [vmem:[%s3586_s3 + $0x400] sm:$0xff]  ;;  %v799_v16 = vld [vmem:[%s3586_s3 + $0x408] sm:$0xff]  ;;  %v578_v18 = vmul.f32 1.442695, %v560_v63 }
 0x11a   : > { %v622_v39 = vsel %vm542_vm1, %v464_v58, %v1609_v24  ;;  %vm546_vm3 = vcmp.gt.f32.partialorder %v2860_v15, 0.0  ;;  %v817_v24 = vld [vmem:[%s3586_s3 + $0x498] sm:$0xff]  ;;  %v803_v63 = vld [vmem:[%s3586_s3 + $0x428] sm:$0xff] }
 0x11b   : > { %v2323_v23 = vpop.eup %2322  ;;  %v582_v27 = vmul.f32 1.442695, %v562_v21  ;;  %v2876_v28 = vadd.f32 %v1682_v22, %v2851_v55  ;;  %v1683_v29 = vpop.f32.mrb[12].mxu0  ;;  %v729_v22 = vld [vmem:[%s3586_s3 + $0x1d8] sm:$0xff] }
 0x11c   : > { %v1610_v30 = vadd.f32 -1.0, %v2323_v23  ;;  %v1684_v32 = vpop.f32.mrb[13].mxu0  ;;  %v816_v23 = vld [vmem:[%s3586_s3 + $0x490] sm:$0xff]  ;;  %v2077_v37 = vpack.c.bf16 %v729_v22, %v728_v20  ;;  %v823_v20 = vld [vmem:[%s3586_s3 + $0x4c8] sm:$0xff] }
 0x11d   : > { %2326 = vpow2.f32 %v582_v27  ;;  %v563_v33 = vmin.f32 %v2876_v28, 0.0  ;;  %v1685_v34 = vadd.f32 %v1684_v32, %v1683_v29  ;;  %vm547_vm4 = vcmp.gt.f32.partialorder %v2876_v28, 0.0  ;;  %v712_v32 = vld [vmem:[%s3586_s3 + $0x150] sm:$0xff] }
 0x11e   : > { %v623_v35 = vsel %vm543_vm0, %v469_v0, %v1610_v30  ;;  %v2069_v0 = vpack.c.bf16 %v725_v54, %v724_v53  ;;  %v2155_v30 = vpack.c.bf16 %v799_v16, %v798_v14  ;;  %v2157_v40 = vpack.c.bf16 %v817_v24, %v816_v23  ;;  %v804_v14 = vld [vmem:[%s3586_s3 + $0x430] sm:$0xff]  ;;  %v805_v16 = vld [vmem:[%s3586_s3 + $0x438] sm:$0xff] }
 0x11f   : > { %997 = vmatprep.mubr.f32.mxu1 %v623_v35  ;;  %v584_v42 = vmul.f32 1.442695, %v563_v33  ;;  %v2892_v43 = vadd.f32 %v1685_v34, %v2851_v55  ;;  %v1686_v44 = vpop.f32.mrb[14].mxu0  ;;  %v713_v33 = vld [vmem:[%s3586_s3 + $0x158] sm:$0xff] }
 0x120   : > { %998 = vmatmul.mubr.f32.vlgmr.msra.gmra.mrb[0].mxu1 %v622_v39  ;;  %v1687_v45 = vpop.f32.mrb[15].mxu0 }
 0x121   : > { %2060 = vmatpush3.bf16.msra.mxu1 %v2059_v31  ;;  %2328 = vpow2.f32 %v584_v42  ;;  %v1688_v47 = vadd.f32 %v1687_v45, %v1686_v44  ;;  %v731_v42 = vld [vmem:[%s3586_s3 + $0x1e8] sm:$0xff]  ;;  %v818_v44 = vld [vmem:[%s3586_s3 + $0x4a0] sm:$0xff]  ;;  %vm548_vm11 = vcmp.gt.f32.partialorder %v2892_v43, 0.0 }
 0x122   : > { %2062 = vmatprep.subr.bf16.mxu1 %v2061_v36 }
 0x123   : > { %v2325_v52 = vpop.eup %2324  ;;  %v2911_v56 = vadd.f32 %v1688_v47, %v2851_v55  ;;  %v1689_v57 = vpop.f32.mrb[16].mxu0 }
 0x124   : > { %v1612_v58 = vadd.f32 -1.0, %v2325_v52  ;;  %v1690_v59 = vpop.f32.mrb[17].mxu0  ;;  %v715_v52 = vld [vmem:[%s3586_s3 + $0x168] sm:$0xff] }
 0x125   : > { %2064 = vmatpush3.bf16.msra.mxu1 %v2063_v46  ;;  %v565_v61 = vmin.f32 %v2911_v56, 0.0  ;;  %v2914_v62 = vadd.f32 %v1690_v59, %v1689_v57  ;;  %v732_v59 = vld [vmem:[%s3586_s3 + $0x1f0] sm:$0xff]  ;;  %v2083_v5 = vpack.c.bf16 %v715_v52, %v714_v51  ;;  %vm549_vm5 = vcmp.gt.f32.partialorder %v2911_v56, 0.0 }
 0x126   : > { %2066 = vmatprep.subr.bf16.mxu1 %v2065_v49  ;;  %v625_v3 = vsel %vm545_vm2, %v2856_v9, %v1612_v58  ;;  %v711_v9 = vld [vmem:[%s3586_s3 + $0x148] sm:$0xff]  ;;  %v2079_v49 = vpack.c.bf16 %v713_v33, %v712_v32  ;;  %v2081_v58 = vpack.c.bf16 %v731_v42, %v730_v38 }
 0x127   : > { %v2327_v4 = vpop.eup %2326  ;;  %1067 = vmatprep.mubr.f32.mxu1 %v625_v3  ;;  %v1692_v7 = vpop.f32.mrb[18].mxu0  ;;  %v588_v12 = vmul.f32 1.442695, %v565_v61  ;;  %v2075_v27 = vpack.c.bf16 %v711_v9, %v710_v8  ;;  %v3001_v54 = vadd.f32 %v2914_v62, %v2851_v55  ;;  %v802_v61 = vld [vmem:[%s3586_s3 + $0x420] sm:$0xff]  ;;  %v733_v62 = vld [vmem:[%s3586_s3 + $0x1f8] sm:$0xff] }
 0x128   : > { %v1693_v10 = vpop.f32.mrb[19].mxu0  ;;  %v1613_v13 = vadd.f32 -1.0, %v2327_v4  ;;  %v2085_v9 = vpack.c.bf16 %v733_v62, %v732_v59  ;;  %v787_v62 = vld [vmem:[%s3586_s3 + $0x3a8] sm:$0xff] }
 0x129   : > { %2068 = vmatpush3.bf16.msra.mxu1 %v2067_v60  ;;  %v1694_v17 = vadd.f32 %v1693_v10, %v1692_v7  ;;  %2330 = vpow2.f32 %v588_v12  ;;  %v717_v7 = vld [vmem:[%s3586_s3 + $0x178] sm:$0xff]  ;;  %v566_v8 = vmin.f32 %v3001_v54, 0.0  ;;  %v2163_v10 = vpack.c.bf16 %v803_v63, %v802_v61  ;;  %v782_v12 = vld [vmem:[%s3586_s3 + $0x380] sm:$0xff] }
 0x12a   : > { %2070 = vmatprep.subr.bf16.mxu1 %v2069_v0  ;;  %v626_v34 = vsel %vm546_vm3, %v2860_v15, %v1613_v13  ;;  %2332 = vpow2.f32 %v578_v18  ;;  %v801_v15 = vld [vmem:[%s3586_s3 + $0x418] sm:$0xff]  ;;  %v820_v0 = vld [vmem:[%s3586_s3 + $0x4b0] sm:$0xff]  ;;  %v783_v18 = vld [vmem:[%s3586_s3 + $0x388] sm:$0xff]  ;;  %vm550_vm8 = vcmp.gt.f32.partialorder %v3001_v54, 0.0 }
 0x12b   : > { %v2329_v21 = vpop.eup %2328  ;;  %v2957_v25 = vadd.f32 %v1694_v17, %v2851_v55  ;;  %v1695_v26 = vpop.f32.mrb[20].mxu0  ;;  %v2159_v53 = vpack.c.bf16 %v801_v15, %v800_v41  ;;  %v2165_v13 = vpack.c.bf16 %v821_v1, %v820_v0  ;;  %v2121_v33 = vpack.c.bf16 %v783_v18, %v782_v12  ;;  %v807_v41 = vld [vmem:[%s3586_s3 + $0x448] sm:$0xff]  ;;  %v808_v1 = vld [vmem:[%s3586_s3 + $0x450] sm:$0xff] }
 0x12c   : > { %v1614_v29 = vadd.f32 -1.0, %v2329_v21  ;;  %v1696_v31 = vpop.f32.mrb[21].mxu0  ;;  %v788_v12 = vld [vmem:[%s3586_s3 + $0x3b0] sm:$0xff]  ;;  %v811_v18 = vld [vmem:[%s3586_s3 + $0x468] sm:$0xff] }
 0x12d   : > { %2072 = vmatpush3.bf16.msra.mxu1 %v2071_v11  ;;  %v567_v35 = vmin.f32 %v2957_v25, 0.0  ;;  %v1697_v36 = vadd.f32 %v1696_v31, %v1695_v26  ;;  %v2087_v26 = vpack.c.bf16 %v717_v7, %v716_v6  ;;  %v2167_v31 = vpack.c.bf16 %v805_v16, %v804_v14  ;;  %v789_v14 = vld [vmem:[%s3586_s3 + $0x3b8] sm:$0xff] }
 0x12e   : > { %2074 = vmatprep.subr.bf16.mxu1 %v2073_v19  ;;  %v627_v39 = vsel %vm547_vm4, %v2876_v28, %v1614_v29  ;;  %v819_v28 = vld [vmem:[%s3586_s3 + $0x4a8] sm:$0xff]  ;;  %v822_v19 = vld [vmem:[%s3586_s3 + $0x4c0] sm:$0xff]  ;;  %vm551_vm6 = vcmp.gt.f32.partialorder %v2957_v25, 0.0 }
 0x12f   : > { %1137 = vmatprep.mubr.f32.mxu0 %v627_v39  ;;  %v592_v45 = vmul.f32 1.442695, %v567_v35  ;;  %v2991_v46 = vadd.f32 %v1697_v36, %v2851_v55  ;;  %v1698_v47 = vpop.f32.mrb[22].mxu0  ;;  %v2161_v60 = vpack.c.bf16 %v819_v28, %v818_v44  ;;  %v767_v29 = vld [vmem:[%s3586_s3 + $0x308] sm:$0xff]  ;;  %v785_v35 = vld [vmem:[%s3586_s3 + $0x398] sm:$0xff]  ;;  %v824_v28 = vld [vmem:[%s3586_s3 + $0x4d0] sm:$0xff] }
 0x130   : > { %1138 = vmatmul.mubr.f32.vlgmr.msra.gmra.mrb[32].mxu0 %v626_v34  ;;  %v1699_v50 = vpop.f32.mrb[23].mxu0  ;;  %v784_v34 = vld [vmem:[%s3586_s3 + $0x390] sm:$0xff] }
 0x131   : > { %2076 = vmatpush3.bf16.msra.mxu1 %v2075_v27  ;;  %2156 = vmatpush3.bf16.msra.mxu0 %v2155_v30  ;;  %2334 = vpow2.f32 %v592_v45  ;;  %v1700_v57 = vadd.f32 %v1699_v50, %v1698_v47  ;;  %v766_v27 = vld [vmem:[%s3586_s3 + $0x300] sm:$0xff]  ;;  %v590_v30 = vmul.f32 1.442695, %v566_v8  ;;  %v825_v45 = vld [vmem:[%s3586_s3 + $0x4d8] sm:$0xff]  ;;  %v2125_v50 = vpack.c.bf16 %v785_v35, %v784_v34  ;;  %v812_v35 = vld [vmem:[%s3586_s3 + $0x470] sm:$0xff] }
 0x132   : > { %2078 = vmatprep.subr.bf16.mxu1 %v2077_v37  ;;  %2158 = vmatprep.subr.bf16.mxu0 %v2157_v40  ;;  %v2169_v37 = vpack.c.bf16 %v823_v20, %v822_v19  ;;  %v806_v40 = vld [vmem:[%s3586_s3 + $0x440] sm:$0xff]  ;;  %v2123_v44 = vpack.c.bf16 %v767_v29, %v766_v27  ;;  %v2173_v0 = vpack.c.bf16 %v825_v45, %v824_v28  ;;  %v828_v20 = vld [vmem:[%s3586_s3 + $0x4f0] sm:$0xff]  ;;  %v773_v29 = vld [vmem:[%s3586_s3 + $0x338] sm:$0xff]  ;;  %vm552_vm14 = vcmp.gt.f32.partialorder %v2991_v46, 0.0 }
 0x133   : > { %v3022_v2 = vadd.f32 %v1700_v57, %v2851_v55  ;;  %v1701_v3 = vpop.f32.mrb[24].mxu0  ;;  %v2331_v17 = vpop.eup %2330  ;;  %2336 = vpow2.f32 %v590_v30  ;;  %v769_v57 = vld [vmem:[%s3586_s3 + $0x318] sm:$0xff]  ;;  %v2133_v27 = vpack.c.bf16 %v789_v14, %v788_v12  ;;  %v790_v30 = vld [vmem:[%s3586_s3 + $0x3c0] sm:$0xff]  ;;  %v775_v28 = vld [vmem:[%s3586_s3 + $0x348] sm:$0xff] }
 0x134   : > { %v1702_v4 = vpop.f32.mrb[25].mxu0  ;;  %v2333_v23 = vpop.eup %2332  ;;  %v1616_v36 = vadd.f32 -1.0, %v2331_v17  ;;  %v810_v17 = vld [vmem:[%s3586_s3 + $0x460] sm:$0xff]  ;;  %v792_v45 = vld [vmem:[%s3586_s3 + $0x3d0] sm:$0xff]  ;;  %v779_v12 = vld [vmem:[%s3586_s3 + $0x368] sm:$0xff] }
 0x135   : > { %2080 = vmatpush3.bf16.msra.mxu1 %v2079_v49  ;;  %2160 = vmatpush3.bf16.msra.mxu0 %v2159_v53  ;;  %v1703_v11 = vadd.f32 %v1702_v4, %v1701_v3  ;;  %v1611_v39 = vadd.f32 -1.0, %v2333_v23  ;;  %v768_v53 = vld [vmem:[%s3586_s3 + $0x310] sm:$0xff]  ;;  %vm553_vm10 = vcmp.gt.f32.partialorder %v3022_v2, 0.0 }
 0x136   : > { %2082 = vmatprep.subr.bf16.mxu1 %v2081_v58  ;;  %2162 = vmatprep.subr.bf16.mxu0 %v2161_v60  ;;  %v786_v58 = vld [vmem:[%s3586_s3 + $0x3a0] sm:$0xff]  ;;  %v629_v59 = vsel %vm549_vm5, %v2911_v56, %v1616_v36  ;;  %v2171_v60 = vpack.c.bf16 %v807_v41, %v806_v40  ;;  %v809_v56 = vld [vmem:[%s3586_s3 + $0x458] sm:$0xff]  ;;  %v2127_v7 = vpack.c.bf16 %v769_v57, %v768_v53  ;;  %v863_v57 = vld [vmem:[%s3586_s3 + $0x608] sm:$0xff] }
 0x137   : > { %v3050_v21 = vadd.f32 %v1703_v11, %v2851_v55  ;;  %v1704_v22 = vpop.f32.mrb[26].mxu0  ;;  %v624_v63 = vsel %vm544_vm7, %v2895_v48, %v1611_v39  ;;  %v826_v48 = vld [vmem:[%s3586_s3 + $0x4e0] sm:$0xff]  ;;  %v813_v36 = vld [vmem:[%s3586_s3 + $0x478] sm:$0xff] }
 0x138   : > { %v1705_v24 = vpop.f32.mrb[27].mxu0  ;;  %v770_v11 = vld [vmem:[%s3586_s3 + $0x320] sm:$0xff] }
 0x139   : > { %2084 = vmatpush3.bf16.msra.mxu1 %v2083_v5  ;;  %2164 = vmatpush3.bf16.msra.mxu0 %v2163_v10  ;;  %v1706_v32 = vadd.f32 %v1705_v24, %v1704_v22  ;;  %v827_v5 = vld [vmem:[%s3586_s3 + $0x4e8] sm:$0xff]  ;;  %v2129_v10 = vpack.c.bf16 %v787_v62, %v786_v58  ;;  %v829_v22 = vld [vmem:[%s3586_s3 + $0x4f8] sm:$0xff]  ;;  %v569_v24 = vmin.f32 %v3022_v2, 0.0  ;;  %v862_v53 = vld [vmem:[%s3586_s3 + $0x600] sm:$0xff]  ;;  %vm554_vm12 = vcmp.gt.f32.partialorder %v3050_v21, 0.0 }
 0x13a   : > { %2086 = vmatprep.subr.bf16.mxu1 %v2085_v9  ;;  %2166 = vmatprep.subr.bf16.mxu0 %v2165_v13  ;;  %v771_v9 = vld [vmem:[%s3586_s3 + $0x328] sm:$0xff]  ;;  %v2175_v13 = vpack.c.bf16 %v809_v56, %v808_v1  ;;  %v2177_v16 = vpack.c.bf16 %v827_v5, %v826_v48  ;;  %v2181_v34 = vpack.c.bf16 %v829_v22, %v828_v20  ;;  %v880_v58 = vld [vmem:[%s3586_s3 + $0x690] sm:$0xff]  ;;  %v794_v1 = vld [vmem:[%s3586_s3 + $0x3e0] sm:$0xff] }
 0x13b   : > { %v2335_v38 = vpop.eup %2334  ;;  %v3073_v15 = vadd.f32 %v1706_v32, %v2851_v55  ;;  %v1707_v42 = vpop.f32.mrb[28].mxu0  ;;  %v2131_v23 = vpack.c.bf16 %v771_v9, %v770_v11  ;;  %v596_v40 = vmul.f32 1.442695, %v569_v24  ;;  %v776_v62 = vld [vmem:[%s3586_s3 + $0x350] sm:$0xff]  ;;  %v778_v9 = vld [vmem:[%s3586_s3 + $0x360] sm:$0xff]  ;;  %v885_v22 = vld [vmem:[%s3586_s3 + $0x6b8] sm:$0xff] }
 0x13c   : > { %v1618_v47 = vadd.f32 -1.0, %v2335_v38  ;;  %v1708_v49 = vpop.f32.mrb[29].mxu0  ;;  %v879_v38 = vld [vmem:[%s3586_s3 + $0x688] sm:$0xff]  ;;  %v864_v5 = vld [vmem:[%s3586_s3 + $0x610] sm:$0xff]  ;;  %v570_v24 = vmin.f32 %v3050_v21, 0.0 }
 0x13d   : > { %2088 = vmatpush3.bf16.msra.mxu1 %v2087_v26  ;;  %2168 = vmatpush3.bf16.msra.mxu0 %v2167_v31  ;;  %v571_v51 = vmin.f32 %v3073_v15, 0.0  ;;  %v1709_v52 = vadd.f32 %v1708_v49, %v1707_v42  ;;  %v564_v26 = vmin.f32 %v2892_v43, 0.0  ;;  %v2179_v31 = vpack.c.bf16 %v811_v18, %v810_v17  ;;  %v2337_v32 = vpop.eup %2336  ;;  %v866_v17 = vld [vmem:[%s3586_s3 + $0x620] sm:$0xff]  ;;  %v867_v18 = vld [vmem:[%s3586_s3 + $0x628] sm:$0xff]  ;;  %v884_v20 = vld [vmem:[%s3586_s3 + $0x6b0] sm:$0xff] }
 0x13e   : > { %2122 = vmatprep.subr.bf16.mxu1 %v2121_v33  ;;  %2170 = vmatprep.subr.bf16.mxu0 %v2169_v37  ;;  %v631_v61 = vsel %vm551_vm6, %v2957_v25, %v1618_v47  ;;  %v791_v33 = vld [vmem:[%s3586_s3 + $0x3c8] sm:$0xff]  ;;  %v878_v37 = vld [vmem:[%s3586_s3 + $0x680] sm:$0xff]  ;;  %v2183_v47 = vpack.c.bf16 %v813_v36, %v812_v35  ;;  %v1617_v49 = vadd.f32 -1.0, %v2337_v32  ;;  %vm555_vm9 = vcmp.gt.f32.partialorder %v3073_v15, 0.0  ;;  %v869_v35 = vld [vmem:[%s3586_s3 + $0x638] sm:$0xff] }
 0x13f   : > { %1277 = vmatprep.mubr.f32.mxu0 %v631_v61  ;;  %v600_v3 = vmul.f32 1.442695, %v571_v51  ;;  %v3111_v25 = vadd.f32 %v1709_v52, %v2851_v55  ;;  %v1710_v4 = vpop.f32.mrb[30].mxu0  ;;  %v586_v41 = vmul.f32 1.442695, %v564_v26  ;;  %v2137_v42 = vpack.c.bf16 %v791_v33, %v790_v30  ;;  %v793_v51 = vld [vmem:[%s3586_s3 + $0x3d8] sm:$0xff] }
 0x140   : > { %1068 = vmatmul.mubr.f32.vlgmr.msra.gmra.mrb[2].mxu1 %v624_v63  ;;  %v1711_v6 = vpop.f32.mrb[31].mxu0  ;;  %v2217_v52 = vpack.c.bf16 %v879_v38, %v878_v37  ;;  %v2141_v63 = vpack.c.bf16 %v793_v51, %v792_v45  ;;  %v630_v56 = vsel %vm550_vm8, %v3001_v54, %v1617_v49  ;;  %v883_v54 = vld [vmem:[%s3586_s3 + $0x6a8] sm:$0xff]  ;;  %v2227_v30 = vpack.c.bf16 %v867_v18, %v866_v17  ;;  %v886_v37 = vld [vmem:[%s3586_s3 + $0x6c0] sm:$0xff] }
 0x141   : > { %2124 = vmatpush3.bf16.msra.mxu1 %v2123_v44  ;;  %1207 = vmatprep.mubr.f32.mxu1 %v629_v59  ;;  %2338 = vpow2.f32 %v600_v3  ;;  %v1712_v8 = vadd.f32 %v1711_v6, %v1710_v4  ;;  %v774_v44 = vld [vmem:[%s3586_s3 + $0x340] sm:$0xff]  ;;  %v881_v59 = vld [vmem:[%s3586_s3 + $0x698] sm:$0xff]  ;;  %v2219_v3 = vpack.c.bf16 %v863_v57, %v862_v53  ;;  %v795_v4 = vld [vmem:[%s3586_s3 + $0x3e8] sm:$0xff]  ;;  %v2229_v33 = vpack.c.bf16 %v885_v22, %v884_v20 }
 0x142   : > { %2126 = vmatprep.subr.bf16.mxu1 %v2125_v50  ;;  %2172 = vmatpush3.bf16.msra.mxu0 %v2171_v60  ;;  %v2139_v61 = vpack.c.bf16 %v775_v28, %v774_v44  ;;  %2340 = vpow2.f32 %v596_v40  ;;  %v2221_v48 = vpack.c.bf16 %v881_v59, %v880_v58  ;;  %v865_v6 = vld [vmem:[%s3586_s3 + $0x618] sm:$0xff]  ;;  %v2145_v11 = vpack.c.bf16 %v795_v4, %v794_v1  ;;  %v847_v32 = vld [vmem:[%s3586_s3 + $0x588] sm:$0xff]  ;;  %v848_v28 = vld [vmem:[%s3586_s3 + $0x590] sm:$0xff] }
 0x143   : > { %2174 = vmatprep.subr.bf16.mxu0 %v2173_v0  ;;  %v3138_v19 = vadd.f32 %v1712_v8, %v2851_v55  ;;  %v772_v55 = vld [vmem:[%s3586_s3 + $0x330] sm:$0xff]  ;;  %2342 = vpow2.f32 %v586_v41  ;;  %v777_v0 = vld [vmem:[%s3586_s3 + $0x358] sm:$0xff]  ;;  %v2223_v14 = vpack.c.bf16 %v865_v6, %v864_v5  ;;  %v887_v38 = vld [vmem:[%s3586_s3 + $0x6c8] sm:$0xff]  ;;  %v598_v40 = vmul.f32 1.442695, %v570_v24 }
 0x144   : > { %v2135_v39 = vpack.c.bf16 %v773_v29, %v772_v55  ;;  %v781_v55 = vld [vmem:[%s3586_s3 + $0x378] sm:$0xff]  ;;  %v846_v29 = vld [vmem:[%s3586_s3 + $0x580] sm:$0xff]  ;;  %v831_v44 = vld [vmem:[%s3586_s3 + $0x508] sm:$0xff]  ;;  %v2233_v51 = vpack.c.bf16 %v887_v38, %v886_v37  ;;  %v568_v20 = vmin.f32 %v2991_v46, 0.0  ;;  %vm556_vm15 = vcmp.gt.f32.partialorder %v3111_v25, 0.0 }
 0x145   : > { %2128 = vmatpush3.bf16.msra.mxu1 %v2127_v7  ;;  %v882_v7 = vld [vmem:[%s3586_s3 + $0x6a0] sm:$0xff]  ;;  %v2185_v41 = vpack.c.bf16 %v847_v32, %v846_v29  ;;  %v871_v53 = vld [vmem:[%s3586_s3 + $0x648] sm:$0xff]  ;;  %v888_v57 = vld [vmem:[%s3586_s3 + $0x6d0] sm:$0xff]  ;;  %2344 = vpow2.f32 %v598_v40  ;;  %v573_v18 = vmin.f32 %v3138_v19, 0.0  ;;  %vm557_vm13 = vcmp.gt.f32.partialorder %v3138_v19, 0.0 }
 0x146   : > { %2130 = vmatprep.subr.bf16.mxu1 %v2129_v10  ;;  %2176 = vmatpush3.bf16.msra.mxu0 %v2175_v13  ;;  %v2143_v10 = vpack.c.bf16 %v777_v0, %v776_v62  ;;  %v796_v13 = vld [vmem:[%s3586_s3 + $0x3f0] sm:$0xff]  ;;  %v889_v58 = vld [vmem:[%s3586_s3 + $0x6d8] sm:$0xff]  ;;  %v850_v62 = vld [vmem:[%s3586_s3 + $0x5a0] sm:$0xff] }
 0x147   : > { %2178 = vmatprep.subr.bf16.mxu0 %v2177_v16  ;;  %v2225_v16 = vpack.c.bf16 %v883_v54, %v882_v7  ;;  %v2237_v4 = vpack.c.bf16 %v889_v58, %v888_v57  ;;  %v873_v5 = vld [vmem:[%s3586_s3 + $0x658] sm:$0xff]  ;;  %v834_v54 = vld [vmem:[%s3586_s3 + $0x520] sm:$0xff]  ;;  %v855_v29 = vld [vmem:[%s3586_s3 + $0x5c8] sm:$0xff] }
 0x148   : > { %v837_v24 = vld [vmem:[%s3586_s3 + $0x538] sm:$0xff]  ;;  %v838_v37 = vld [vmem:[%s3586_s3 + $0x540] sm:$0xff]  ;;  %v839_v38 = vld [vmem:[%s3586_s3 + $0x548] sm:$0xff] }
 0x149   : > { %2132 = vmatpush3.bf16.msra.mxu1 %v2131_v23  ;;  %v2147_v23 = vpack.c.bf16 %v779_v12, %v778_v9  ;;  %v853_v9 = vld [vmem:[%s3586_s3 + $0x5b8] sm:$0xff]  ;;  %v842_v57 = vld [vmem:[%s3586_s3 + $0x560] sm:$0xff]  ;;  %v860_v58 = vld [vmem:[%s3586_s3 + $0x5f0] sm:$0xff] }
 0x14a   : > { %2134 = vmatprep.subr.bf16.mxu1 %v2133_v27  ;;  %2180 = vmatpush3.bf16.msra.mxu0 %v2179_v31  ;;  %v780_v27 = vld [vmem:[%s3586_s3 + $0x370] sm:$0xff]  ;;  %v877_v32 = vld [vmem:[%s3586_s3 + $0x678] sm:$0xff] }
 0x14b   : > { %v2339_v50 = vpop.eup %2338  ;;  %2182 = vmatprep.subr.bf16.mxu0 %v2181_v34  ;;  %v868_v34 = vld [vmem:[%s3586_s3 + $0x630] sm:$0xff] }
 0x14c   : > { %v1622_v60 = vadd.f32 -1.0, %v2339_v50  ;;  %v2341_v31 = vpop.eup %2340  ;;  %v2231_v45 = vpack.c.bf16 %v869_v35, %v868_v34  ;;  %v849_v50 = vld [vmem:[%s3586_s3 + $0x598] sm:$0xff]  ;;  %v604_v34 = vmul.f32 1.442695, %v573_v18  ;;  %v594_v35 = vmul.f32 1.442695, %v568_v20 }
 0x14d   : > { %2136 = vmatpush3.bf16.msra.mxu1 %v2135_v39  ;;  %v2343_v36 = vpop.eup %2342  ;;  %v2151_v39 = vpack.c.bf16 %v781_v55, %v780_v27  ;;  %v916_v18 = vld [vmem:[%s3586_s3 + $0x7b0] sm:$0xff]  ;;  %v917_v20 = vld [vmem:[%s3586_s3 + $0x7b8] sm:$0xff] }
 0x14e   : > { %2138 = vmatprep.subr.bf16.mxu1 %v2137_v42  ;;  %2184 = vmatpush3.bf16.msra.mxu0 %v2183_v47  ;;  %v635_v8 = vsel %vm555_vm9, %v3073_v15, %v1622_v60  ;;  %v797_v15 = vld [vmem:[%s3586_s3 + $0x3f8] sm:$0xff]  ;;  %v830_v42 = vld [vmem:[%s3586_s3 + $0x500] sm:$0xff]  ;;  %v1620_v47 = vadd.f32 -1.0, %v2341_v31  ;;  %v1615_v49 = vadd.f32 -1.0, %v2343_v36  ;;  %v2189_v60 = vpack.c.bf16 %v849_v50, %v848_v28  ;;  %v876_v31 = vld [vmem:[%s3586_s3 + $0x670] sm:$0xff] }
 0x14f   : > { %2218 = vmatprep.subr.bf16.mxu0 %v2217_v52  ;;  %v2149_v26 = vpack.c.bf16 %v797_v15, %v796_v13  ;;  %v870_v52 = vld [vmem:[%s3586_s3 + $0x640] sm:$0xff]  ;;  %v2187_v59 = vpack.c.bf16 %v831_v44, %v830_v42  ;;  %v892_v15 = vld [vmem:[%s3586_s3 + $0x6f0] sm:$0xff]  ;;  %v2345_v55 = vpop.eup %2344  ;;  %v857_v42 = vld [vmem:[%s3586_s3 + $0x5d8] sm:$0xff]  ;;  %v2203_v44 = vpack.c.bf16 %v839_v38, %v838_v37  ;;  %2346 = vpow2.f32 %v604_v34 }
 0x150   : > { %v633_v0 = vsel %vm553_vm10, %v3022_v2, %v1620_v47  ;;  %v2235_v1 = vpack.c.bf16 %v871_v53, %v870_v52  ;;  %v890_v2 = vld [vmem:[%s3586_s3 + $0x6e0] sm:$0xff]  ;;  %v1621_v40 = vadd.f32 -1.0, %v2345_v55  ;;  %2348 = vpow2.f32 %v594_v35  ;;  %v841_v47 = vld [vmem:[%s3586_s3 + $0x558] sm:$0xff]  ;;  %v903_v34 = vld [vmem:[%s3586_s3 + $0x748] sm:$0xff] }
 0x151   : > { %2140 = vmatpush3.bf16.msra.mxu1 %v2139_v61  ;;  %1278 = vmatmul.mubr.f32.vlgmr.msra.gmra.mrb[34].mxu0 %v630_v56  ;;  %v832_v61 = vld [vmem:[%s3586_s3 + $0x510] sm:$0xff]  ;;  %v628_v56 = vsel %vm548_vm11, %v2892_v43, %v1615_v49  ;;  %v891_v43 = vld [vmem:[%s3586_s3 + $0x6e8] sm:$0xff]  ;;  %v874_v13 = vld [vmem:[%s3586_s3 + $0x660] sm:$0xff] }
 0x152   : > { %2142 = vmatprep.subr.bf16.mxu1 %v2141_v63  ;;  %2220 = vmatpush3.bf16.msra.mxu0 %v2219_v3  ;;  %v833_v63 = vld [vmem:[%s3586_s3 + $0x518] sm:$0xff]  ;;  %v851_v3 = vld [vmem:[%s3586_s3 + $0x5a8] sm:$0xff]  ;;  %v2241_v12 = vpack.c.bf16 %v891_v43, %v890_v2  ;;  %v634_v49 = vsel %vm554_vm12, %v3050_v21, %v1621_v40  ;;  %v858_v50 = vld [vmem:[%s3586_s3 + $0x5e0] sm:$0xff] }
 0x153   : > { %2222 = vmatprep.subr.bf16.mxu0 %v2221_v48  ;;  %1417 = vmatprep.mubr.f32.mxu0 %v635_v8  ;;  %v872_v48 = vld [vmem:[%s3586_s3 + $0x650] sm:$0xff]  ;;  %v2191_v6 = vpack.c.bf16 %v833_v63, %v832_v61  ;;  %v2193_v7 = vpack.c.bf16 %v851_v3, %v850_v62  ;;  %v835_v8 = vld [vmem:[%s3586_s3 + $0x528] sm:$0xff]  ;;  %v845_v62 = vld [vmem:[%s3586_s3 + $0x578] sm:$0xff] }
 0x154   : > { %v2195_v17 = vpack.c.bf16 %v835_v8, %v834_v54  ;;  %v843_v21 = vld [vmem:[%s3586_s3 + $0x568] sm:$0xff]  ;;  %v844_v63 = vld [vmem:[%s3586_s3 + $0x570] sm:$0xff]  ;;  %v913_v54 = vld [vmem:[%s3586_s3 + $0x798] sm:$0xff] }
 0x155   : > { %2144 = vmatpush3.bf16.msra.mxu1 %v2143_v10  ;;  %v852_v10 = vld [vmem:[%s3586_s3 + $0x5b0] sm:$0xff]  ;;  %v895_v2 = vld [vmem:[%s3586_s3 + $0x708] sm:$0xff]  ;;  %v918_v55 = vld [vmem:[%s3586_s3 + $0x7c0] sm:$0xff] }
 0x156   : > { %2146 = vmatprep.subr.bf16.mxu1 %v2145_v11  ;;  %2224 = vmatpush3.bf16.msra.mxu0 %v2223_v14  ;;  %v2239_v11 = vpack.c.bf16 %v873_v5, %v872_v48  ;;  %v875_v14 = vld [vmem:[%s3586_s3 + $0x668] sm:$0xff]  ;;  %v2197_v22 = vpack.c.bf16 %v853_v9, %v852_v10  ;;  %v894_v5 = vld [vmem:[%s3586_s3 + $0x700] sm:$0xff]  ;;  %v897_v9 = vld [vmem:[%s3586_s3 + $0x718] sm:$0xff] }
 0x157   : > { %2226 = vmatprep.subr.bf16.mxu0 %v2225_v16  ;;  %v893_v16 = vld [vmem:[%s3586_s3 + $0x6f8] sm:$0xff]  ;;  %v2243_v27 = vpack.c.bf16 %v875_v14, %v874_v13  ;;  %v2251_v8 = vpack.c.bf16 %v895_v2, %v894_v5  ;;  %v914_v14 = vld [vmem:[%s3586_s3 + $0x7a0] sm:$0xff]  ;;  %v920_v35 = vld [vmem:[%s3586_s3 + $0x7d0] sm:$0xff] }
 0x158   : > { %v905_v40 = vld [vmem:[%s3586_s3 + $0x758] sm:$0xff] }
 0x159   : > { %2148 = vmatpush3.bf16.msra.mxu1 %v2147_v23  ;;  %v836_v23 = vld [vmem:[%s3586_s3 + $0x530] sm:$0xff] }
 0x15a   : > { %2150 = vmatprep.subr.bf16.mxu1 %v2149_v26  ;;  %2228 = vmatpush3.bf16.msra.mxu0 %v2227_v30  ;;  %v854_v26 = vld [vmem:[%s3586_s3 + $0x5c0] sm:$0xff]  ;;  %v2245_v30 = vpack.c.bf16 %v893_v16, %v892_v15  ;;  %v915_v15 = vld [vmem:[%s3586_s3 + $0x7a8] sm:$0xff] }
 0x15b   : > { %2230 = vmatprep.subr.bf16.mxu0 %v2229_v33  ;;  %v2199_v33 = vpack.c.bf16 %v837_v24, %v836_v23  ;;  %v2201_v36 = vpack.c.bf16 %v855_v29, %v854_v26  ;;  %v572_v23 = vmin.f32 %v3111_v25, 0.0  ;;  %v2261_v24 = vpack.c.bf16 %v917_v20, %v916_v18  ;;  %v900_v26 = vld [vmem:[%s3586_s3 + $0x730] sm:$0xff]  ;;  %v919_v29 = vld [vmem:[%s3586_s3 + $0x7c8] sm:$0xff] }
 0x15d   : > { %2152 = vmatpush3.bf16.msra.mxu1 %v2151_v39  ;;  %v2247_v39 = vpack.c.bf16 %v877_v32, %v876_v31  ;;  %v602_v31 = vmul.f32 1.442695, %v572_v23  ;;  %v2265_v32 = vpack.c.bf16 %v919_v29, %v918_v55 }
 0x15e   : > { %2186 = vmatprep.subr.bf16.mxu1 %v2185_v41  ;;  %2232 = vmatpush3.bf16.msra.mxu0 %v2231_v45  ;;  %v856_v41 = vld [vmem:[%s3586_s3 + $0x5d0] sm:$0xff] }
 0x15f   : > { %2234 = vmatprep.subr.bf16.mxu0 %v2233_v51  ;;  %v2205_v28 = vpack.c.bf16 %v857_v42, %v856_v41  ;;  %v840_v45 = vld [vmem:[%s3586_s3 + $0x550] sm:$0xff]  ;;  %v859_v51 = vld [vmem:[%s3586_s3 + $0x5e8] sm:$0xff]  ;;  %2350 = vpow2.f32 %v602_v31  ;;  %v922_v41 = vld [vmem:[%s3586_s3 + $0x7e0] sm:$0xff] }
 0x160   : > { %1208 = vmatmul.mubr.f32.vlgmr.msra.gmra.mrb[4].mxu1 %v628_v56  ;;  %v2207_v52 = vpack.c.bf16 %v841_v47, %v840_v45  ;;  %v2209_v53 = vpack.c.bf16 %v859_v51, %v858_v50  ;;  %v911_v56 = vld [vmem:[%s3586_s3 + $0x788] sm:$0xff]  ;;  %v906_v45 = vld [vmem:[%s3586_s3 + $0x760] sm:$0xff]  ;;  %v925_v50 = vld [vmem:[%s3586_s3 + $0x7f8] sm:$0xff] }
 0x161   : > { %2188 = vmatpush3.bf16.msra.mxu1 %v2187_v59  ;;  %1347 = vmatprep.mubr.f32.mxu1 %v633_v0  ;;  %v861_v59 = vld [vmem:[%s3586_s3 + $0x5f8] sm:$0xff]  ;;  %v2347_v0 = vpop.eup %2346  ;;  %v923_v42 = vld [vmem:[%s3586_s3 + $0x7e8] sm:$0xff]  ;;  %v1627_v31 = vld [vmem:[%s3590_s7] ss:$0 sm:$0xff] }
 0x162   : > { %2190 = vmatprep.subr.bf16.mxu1 %v2189_v60  ;;  %2236 = vmatpush3.bf16.msra.mxu0 %v2235_v1  ;;  %v2211_v60 = vpack.c.bf16 %v843_v21, %v842_v57  ;;  %v2213_v61 = vpack.c.bf16 %v861_v59, %v860_v58  ;;  %v910_v1 = vld [vmem:[%s3586_s3 + $0x780] sm:$0xff]  ;;  %v2349_v3 = vpop.eup %2348  ;;  %v1624_v43 = vadd.f32 -1.0, %v2347_v0  ;;  %v907_v47 = vld [vmem:[%s3586_s3 + $0x768] sm:$0xff]  ;;  %v909_v57 = vld [vmem:[%s3586_s3 + $0x778] sm:$0xff] }
 0x163   : > { %2238 = vmatprep.subr.bf16.mxu0 %v2237_v4  ;;  %v2215_v4 = vpack.c.bf16 %v845_v62, %v844_v63  ;;  %v2249_v48 = vpack.c.bf16 %v911_v56, %v910_v1  ;;  %v2275_v51 = vpack.c.bf16 %v907_v47, %v906_v45 }
 0x165   : > { %2192 = vmatpush3.bf16.msra.mxu1 %v2191_v6  ;;  %v1619_v6 = vadd.f32 -1.0, %v2349_v3  ;;  %v1625_v3 = vld [vmem:[%s3587_s4] ss:$0 sm:$0xff] }
 0x166   : > { %2194 = vmatprep.subr.bf16.mxu1 %v2193_v7  ;;  %2240 = vmatpush3.bf16.msra.mxu0 %v2239_v11  ;;  %v912_v7 = vld [vmem:[%s3586_s3 + $0x790] sm:$0xff] }
 0x167   : > { %2242 = vmatprep.subr.bf16.mxu0 %v2241_v12  ;;  %v2253_v10 = vpack.c.bf16 %v913_v54, %v912_v7  ;;  %v896_v11 = vld [vmem:[%s3586_s3 + $0x710] sm:$0xff]  ;;  %v637_v12 = vsel %vm557_vm13, %v3138_v19, %v1624_v43  ;;  %v632_v13 = vsel %vm552_vm14, %v2991_v46, %v1619_v6  ;;  %v898_v19 = vld [vmem:[%s3586_s3 + $0x720] sm:$0xff]  ;;  %v899_v46 = vld [vmem:[%s3586_s3 + $0x728] sm:$0xff] }
 0x168   : > { %v2255_v16 = vpack.c.bf16 %v897_v9, %v896_v11 }
 0x169   : > { %2196 = vmatpush3.bf16.msra.mxu1 %v2195_v17  ;;  %v2257_v17 = vpack.c.bf16 %v915_v15, %v914_v14  ;;  %v2351_v21 = vpop.eup %2350 }
 0x16a   : > { %2198 = vmatprep.subr.bf16.mxu1 %v2197_v22  ;;  %2244 = vmatpush3.bf16.msra.mxu0 %v2243_v27  ;;  %v2259_v22 = vpack.c.bf16 %v899_v46, %v898_v19  ;;  %v901_v27 = vld [vmem:[%s3586_s3 + $0x738] sm:$0xff]  ;;  %v1623_v59 = vadd.f32 -1.0, %v2351_v21 }
 0x16b   : > { %2246 = vmatprep.subr.bf16.mxu0 %v2245_v30  ;;  %v2263_v30 = vpack.c.bf16 %v901_v27, %v900_v26  ;;  %v1626_v27 = vld [vmem:[%s3589_s6] ss:$0 sm:$0xff] }
 0x16d   : > { %2200 = vmatpush3.bf16.msra.mxu1 %v2199_v33  ;;  %v902_v33 = vld [vmem:[%s3586_s3 + $0x740] sm:$0xff] }
 0x16e   : > { %2202 = vmatprep.subr.bf16.mxu1 %v2201_v36  ;;  %2248 = vmatpush3.bf16.msra.mxu0 %v2247_v39  ;;  %v921_v36 = vld [vmem:[%s3586_s3 + $0x7d8] sm:$0xff]  ;;  %v2267_v37 = vpack.c.bf16 %v903_v34, %v902_v33  ;;  %v904_v39 = vld [vmem:[%s3586_s3 + $0x750] sm:$0xff] }
 0x16f   : > { %v2269_v38 = vpack.c.bf16 %v921_v36, %v920_v35 }
 0x171   : > { %2204 = vmatpush3.bf16.msra.mxu1 %v2203_v44  ;;  %1418 = vmatmul.mubr.f32.vlgmr.msra.gmra.mrb[36].mxu0 %v634_v49  ;;  %v2271_v44 = vpack.c.bf16 %v905_v40, %v904_v39  ;;  %v924_v49 = vld [vmem:[%s3586_s3 + $0x7f0] sm:$0xff] }
 0x172   : > { %2206 = vmatprep.subr.bf16.mxu1 %v2205_v28  ;;  %v2273_v28 = vpack.c.bf16 %v923_v42, %v922_v41 }
 0x175   : > { %2208 = vmatpush3.bf16.msra.mxu1 %v2207_v52  ;;  %v2277_v52 = vpack.c.bf16 %v925_v50, %v924_v49 }
 0x176   : > { %2210 = vmatprep.subr.bf16.mxu1 %v2209_v53  ;;  %v908_v53 = vld [vmem:[%s3586_s3 + $0x770] sm:$0xff] }
 0x177   : > { %v2279_v58 = vpack.c.bf16 %v909_v57, %v908_v53 }
 0x179   : > { %2212 = vmatpush3.bf16.msra.mxu1 %v2211_v60  ;;  %v636_v60 = vsel %vm556_vm15, %v3111_v25, %v1623_v59 }
 0x17a   : > { %2214 = vmatprep.subr.bf16.mxu1 %v2213_v61 }
 0x17d   : > { %2216 = vmatpush3.bf16.msra.mxu1 %v2215_v4 }
 0x17e   : > { %2250 = vmatprep.subr.bf16.mxu1 %v2249_v48 }
 0x180   : > { %1348 = vmatmul.mubr.f32.vlgmr.msra.gmra.mrb[6].mxu1 %v632_v13 }
 0x181   : > { %2252 = vmatpush3.bf16.msra.mxu1 %v2251_v8  ;;  %1487 = vmatprep.mubr.f32.mxu1 %v637_v12 }
 0x182   : > { %2254 = vmatprep.subr.bf16.mxu1 %v2253_v10 }
 0x185   : > { %2256 = vmatpush3.bf16.msra.mxu1 %v2255_v16 }
 0x186   : > { %2258 = vmatprep.subr.bf16.mxu1 %v2257_v17 }
 0x189   : > { %2260 = vmatpush3.bf16.msra.mxu1 %v2259_v22 }
 0x18a   : > { %2262 = vmatprep.subr.bf16.mxu1 %v2261_v24  ;;  %v1493_v24 = vld [vmem:[%s325_s23] sm:$0xff]  ;;  %s1515_s23 = scalar_lea.sflag [#allocation4], %s312_s10 }
 0x18d   : > { %2264 = vmatpush3.bf16.msra.mxu1 %v2263_v30 }
 0x18e   : > { %2266 = vmatprep.subr.bf16.mxu1 %v2265_v32 }
 0x191   : > { %2268 = vmatpush3.bf16.msra.mxu1 %v2267_v37 }
 0x192   : > { %2270 = vmatprep.subr.bf16.mxu1 %v2269_v38 }
 0x195   : > { %2272 = vmatpush3.bf16.msra.mxu1 %v2271_v44 }
 0x196   : > { %2274 = vmatprep.subr.bf16.mxu1 %v2273_v28 }
 0x199   : > { %2276 = vmatpush3.bf16.msra.mxu1 %v2275_v51 }
 0x19a   : > { %2278 = vmatprep.subr.bf16.mxu1 %v2277_v52 }
 0x19d   : > { %2280 = vmatpush3.bf16.msra.mxu1 %v2279_v58 }
 0x1a0   : > { %1488 = vmatmul.mubr.f32.vlgmr.msra.gmra.mrb[8].mxu1 %v636_v60 }
 0x1f3   : > { %v1745_v61 = vpop.f32.mrb[0].mxu1 }
 0x1f4   : > { %v1746_v63 = vpop.f32.mrb[1].mxu1 }
 0x1f5   : > { %v1747_v62 = vadd.f32 %v1746_v63, %v1745_v61 }
 0x1f7   : > { %v1000_v5 = vadd.f32 %v1747_v62, %v1625_v3 }
 0x203   : > { %v1815_v0 = vpop.f32.mrb[32].mxu0 }
 0x204   : > { %v1816_v1 = vpop.f32.mrb[33].mxu0 }
 0x205   : > { %v1817_v56 = vadd.f32 %v1816_v1, %v1815_v0 }
 0x213   : > { %v1780_v4 = vpop.f32.mrb[2].mxu1 }
 0x214   : > { %v1781_v48 = vpop.f32.mrb[3].mxu1 }
 0x215   : > { %v1782_v2 = vadd.f32 %v1781_v48, %v1780_v4 }
 0x217   : > { %v1070_v43 = vadd.f32 %v1782_v2, %v1000_v5 }
 0x219   : > { %v1140_v6 = vadd.f32 %v1817_v56, %v1070_v43 }
 0x224   : > { %v1885_v7 = vpop.f32.mrb[34].mxu0 }
 0x225   : > { %v1886_v25 = vpop.f32.mrb[35].mxu0 }
 0x226   : > { %v1887_v54 = vadd.f32 %v1886_v25, %v1885_v7 }
 0x233   : > { %v1850_v8 = vpop.f32.mrb[4].mxu1 }
 0x234   : > { %v1851_v10 = vpop.f32.mrb[5].mxu1 }
 0x235   : > { %v1852_v11 = vadd.f32 %v1851_v10, %v1850_v8 }
 0x237   : > { %v1210_v9 = vadd.f32 %v1852_v11, %v1140_v6 }
 0x239   : > { %v1280_v12 = vadd.f32 %v1887_v54, %v1210_v9 }
 0x244   : > { %v1955_v13 = vpop.f32.mrb[36].mxu0 }
 0x245   : > { %v1956_v14 = vpop.f32.mrb[37].mxu0 }
 0x246   : > { %v1957_v15 = vadd.f32 %v1956_v14, %v1955_v13 }
 0x253   : > { %v1920_v16 = vpop.f32.mrb[6].mxu1 }
 0x254   : > { %v1921_v17 = vpop.f32.mrb[7].mxu1 }
 0x255   : > { %v1922_v19 = vadd.f32 %v1921_v17, %v1920_v16 }
 0x257   : > { %v1350_v46 = vadd.f32 %v1922_v19, %v1280_v12 }
 0x259   : > { %v1420_v18 = vadd.f32 %v1957_v15, %v1350_v46 }
 0x273   : > { %v1990_v20 = vpop.f32.mrb[8].mxu1 }
 0x274   : > { %v1991_v22 = vpop.f32.mrb[9].mxu1 }
 0x275   : > { %v1992_v23 = vadd.f32 %v1991_v22, %v1990_v20 }
 0x277   : > { %v1490_v26 = vadd.f32 %v1992_v23, %v1420_v18 }
 0x279   : > { %v1494_v55 = vsub.f32 %v1493_v24, %v1490_v26 }
 0x27b   : > { %v1502_v29 = vmul.f32 %v1626_v27, %v1494_v55 }
 0x27d   : > { %v1503_v30 = vmul.f32 %v1502_v29, %v1502_v29 }
 0x27f   : > { %v1504_v32 = vmul.f32 -0.5, %v1503_v30 }
 0x281   : > { %v1512_v33 = vadd.f32 %v1627_v31, %v1504_v32 }
 0x283   : > { %1513 = vst [vmem:[%s314_s20] sm:$0xff] %v1512_v33 }
 0x284   : > { %2365 = shalt.err (!%p2362_p4)
}
 0x285   : > { %s2366_s10 = scalar_lea.hbm %s3541_s26, 128  ;;  %s2370_s17 = scalar_lea.hbm %s3591_s8, 256 }
 0x286   : > { %p2367_p7 = scmp.ne.s32.totalorder %s3541_s26, %s2366_s10  ;;  %p2371_p10 = scmp.lt.u32.totalorder %s3541_s26, %s3591_s8 }
 0x287   : > { %p2372_p11 = scmp.lt.u32.totalorder %s2370_s17, %s2366_s10  ;;  %p2374_p13 = scmp.lt.u32.totalorder %s2366_s10, %s3541_s26 }
 0x288   : > { %p2368_p8 = pnand %p2367_p7, %p2500_p5 }
 0x289   : > { %p2373_p12 = por %p2372_p11, %p2371_p10 }
 0x28a   : > { %p2369_p9 = pneg %p2368_p8 }
 0x28b   : > { %p2375_p0 = por %p2374_p13, %p2373_p12 }
 0x28d   : > { %p2376_p1 = pnand %p2375_p0, %p2369_p9 }
 0x28f   : > { %2379 = shalt.err (!%p2376_p1)
}
 0x290   : > { %2281 = dma.vmem_to_hbm [thread:$0]  (%p2500_p5), %s3543_s21, 128, %s3541_s26, %s1515_s23  }
 0x291 PF: > { %p2287_p2 = scmp.ge.s32.totalorder %s2414_s30, 2  ;;  %s1540_s24 = sand.u32 1, %s2402_s27  }
 0x292   : > { %s1541_s12 = scalar_lea.sflag [#allocation4], %s1540_s24 }
 0x293   : > { %p2284_p3 = pnand %p2287_p2, %p2504_p6 }
 0x295   : > { %2397 = dma.done.wait (!%p2284_p3), %s1541_s12, 128  }
 0x296   : > { %2399 = vsyncadd (!%p2284_p3), %s1541_s12, 4294967168  ;;  %p18_p4 = scmp.ge.s32.totalorder %s2487_s11, 4   ;;  %s3594_s27 = smov %s2406_s28 }
 0x297   : > { %s3595_s28 = smov %s2410_s29  ;;  %s3596_s29 = smov %s2498_s14 }
 0x298   : > { %s3597_s30 = smov %s2487_s11  ;;  %20 = sbr.rel (!%p18_p4) target bundleno = 3 (0x3), region = 90 }
 0x29f   :  { %1546 = vsyncpa [#allocation4], 1 }
 0x2a0   :  { %1548 = vsyncpa [#allocation4 + $0x1], 1 }

</bundles_post_ra>
